<compile_context>
chip_gen: v7x
topology: tpu7x:2x2x1
jax: 0.10.0
libtpu: 0.0.40
codegen_flags: <defaults>
</compile_context>

<pallas_src>
import functools
import math

import jax
import jax.numpy as jnp
from jax.experimental import pallas as pl
from jax.experimental.pallas import tpu as pltpu


# ----------------------- generation-aware VMEM budgets ---------------------- #
def _vmem_budgets():
    """Return (vmem_limit_bytes, tile_budget_bytes) for the current TPU."""
    cap = None
    try:
        cap = getattr(pltpu.get_tpu_info(), "vmem_capacity_bytes", None)
    except Exception:  # hardware query is best-effort
        cap = None
    if not cap:
        cap = 64 * 1024 * 1024
    if cap >= 96 * 1024 * 1024:                 # v5e / v6e: 128 MiB physical VMEM
        return 100 * 1024 * 1024, 80 * 1024 * 1024
    # v7x (64 MiB per TensorCore) or unknown: leave headroom for Mosaic
    # internal scratch, the pg buffer and softmax temporaries.
    return (cap * 7) // 8, 36 * 1024 * 1024


# ----------------------------- Pallas kernel ------------------------------- #
def _rpe_attn_kernel(q_ref, k_ref, v_ref, qw_ref, e_ref, hid_ref, attn_ref,
                     *, num_heads, head_dim, inv_sqrt_c, mxu_dtype):
    H, c = num_heads, head_dim

    def mx(x):  # MXU operand dtype (f32 accumulation everywhere)
        return x if mxu_dtype is None else x.astype(mxu_dtype)

    e = mx(e_ref[0])                                      # (tN, M, C)  dominant stream
    qw = mx(qw_ref[0])                                    # (tN, H, C)  q @ Wp_head

    # Relative-position scores for all heads in one batched MXU contraction
    # (batch = query rows).  The (tN, H, M) result keeps the key axis M on
    # lanes; the transposed orientation ('nmi,nhi->nmh') would put H (<= 8) on
    # the lane dim and blow the temporary up by 128/H.
    # TODO(synk): verify MXU weight-push counts for the production (M, C, H)
    #             in a bundle dump and sub-tile M if the stationary-operand
    #             pushes dominate after the bf16 traffic win.
    pg = jnp.einsum("nhi,nmi->nhm", qw, e,
                    preferred_element_type=jnp.float32)   # (tN, H, M) f32

    q_all = mx(q_ref[0])                                  # (tN, C)
    k_all = mx(k_ref[0])                                  # (M,  C)
    v_all = v_ref[0]                                      # (M,  C) f32

    # Static unroll over heads: q/k/v/hidden are lane-dense (last dim = C), so
    # the per-head channel slice sits on the lane dim and needs *static*
    # offsets; H is small (typically 4-8) so code size stays bounded and each
    # head's temporaries die inside its own iteration.
    for h in range(H):
        lo = h * c
        q_h = q_all[:, lo:lo + c]                         # (tN, c)
        k_h = k_all[:, lo:lo + c]                         # (M,  c)
        v_h = v_all[:, lo:lo + c]                         # (M,  c)

        # q . k^T on the MXU (contract the per-head channel dim).
        s_e = jax.lax.dot_general(q_h, k_h, (((1,), (1,)), ((), ())),
                                  preferred_element_type=jnp.float32)  # (tN, M)

        # NOTE: the proj_p bias term (q_h . bp_h) is constant along the key
        # axis and cancels exactly in the softmax -> dropped (no qb input).
        scores = (s_e + pg[:, h, :]) * inv_sqrt_c                       # (tN, M)

        m_ = jnp.max(scores, axis=-1, keepdims=True)
        p = jnp.exp(scores - m_)
        denom = jnp.sum(p, axis=-1, keepdims=True)
        attn = p * pl.reciprocal(denom, approx=False)                   # (tN, M)

        attn_ref[0, h] = attn.astype(attn_ref.dtype)                    # lane-dense in M

        # NOTE: casting attn/v to mxu_dtype here slightly perturbs hidden
        # relative to a pure-f32 matmul (documented, acceptable).
        hid = jax.lax.dot_general(mx(attn), mx(v_h), (((1,), (0,)), ((), ())),
                                  preferred_element_type=jnp.float32)   # (tN, c)
        hid_ref[0, :, lo:lo + c] = hid.astype(hid_ref.dtype)


# --------------------------- tiling / pallas_call --------------------------- #
def _round_up(x, m):
    return -(-x // m) * m


def _vmem_block_bytes(tile_n, M, C, H, e_itemsize, attn_itemsize, embed_needs_cast):
    """Rough padded-VMEM estimate of the double-buffered working set."""
    r8 = lambda x: _round_up(x, 8)
    r128 = lambda x: _round_up(x, 128)
    q_blk = r8(tile_n) * r128(C) * 4
    kv_blk = r8(M) * r128(C) * 4
    qw_blk = tile_n * r8(H) * r128(C) * 4
    e_blk = tile_n * r8(M) * r128(C) * e_itemsize
    hid_blk = r8(tile_n) * r128(C) * 4
    attn_blk = H * r8(tile_n) * r128(M) * attn_itemsize
    dbuf = 2 * (q_blk + 2 * kv_blk + qw_blk + e_blk + hid_blk + attn_blk)
    pg_tmp = tile_n * r8(H) * r128(M) * 4
    sm_tmp = 4 * r8(tile_n) * r128(M) * 4
    cast_tmp = tile_n * r8(M) * r128(C) * 2 if embed_needs_cast else 0
    return dbuf + pg_tmp + sm_tmp + cast_tmp


def _choose_tile_n(N, M, C, H, e_itemsize, attn_itemsize, embed_needs_cast,
                   budget, *, max_tile=512, want_multi_tile=False):
    """Largest multiple-of-8 divisor of N that fits `budget`; prefers >= 2 grid
    steps when `want_multi_tile` (so both v7x TensorCores get work)."""
    divisors = [d for d in range(8, min(max_tile, N) + 1, 8) if N % d == 0]
    if not divisors:
        return N  # N < 8 or no multiple-of-8 divisor: single full-N block
    fits = [d for d in divisors
            if _vmem_block_bytes(d, M, C, H, e_itemsize, attn_itemsize,
                                 embed_needs_cast) <= budget]
    if fits:
        if want_multi_tile:
            multi = [d for d in fits if N // d >= 2]
            if multi:
                return max(multi)
        return max(fits)
    # Nothing fits the budget: take the smallest legal tile (never full N).
    # TODO(synk): add an M-tile grid axis (two-pass / online softmax with a
    #             final rescale of the stored attention tiles) so huge M*C on
    #             v7x's 64 MiB VMEM does not collapse tile_n.
    return min(divisors)


def _rpe_attention_core(q, k, v, qw, embed_qk, *, num_heads, tile_n,
                        mxu_dtype, attn_dtype, vmem_limit_bytes):
    """q (B,N,C), k/v (B,M,C), qw (B,N,H,C), embed_qk (B,N,M,C)
       -> hidden (B,N,C) f32, attention (B,H,N,M) attn_dtype."""
    B, N, C = q.shape
    M = k.shape[1]
    H = num_heads
    c = C // H
    assert N % tile_n == 0, (N, tile_n)
    n_tiles = N // tile_n

    kernel = functools.partial(
        _rpe_attn_kernel, num_heads=H, head_dim=c,
        inv_sqrt_c=1.0 / math.sqrt(c), mxu_dtype=mxu_dtype)

    grid_spec = pltpu.PrefetchScalarGridSpec(
        num_scalar_prefetch=0,
        grid=(B, n_tiles),
        in_specs=[
            pl.BlockSpec((1, tile_n, C), lambda b, n: (b, n, 0)),        # q   (lane-dense)
            pl.BlockSpec((1, M, C), lambda b, n: (b, 0, 0)),             # k   (resident across n)
            pl.BlockSpec((1, M, C), lambda b, n: (b, 0, 0)),             # v   (resident across n)
            pl.BlockSpec((1, tile_n, H, C), lambda b, n: (b, n, 0, 0)),  # q @ Wp_head
            # TODO(synk): pipeline_mode=pl.Buffered(3) on this spec is worth
            #             trying on v5e/v6e where VMEM headroom exists.
            pl.BlockSpec((1, tile_n, M, C), lambda b, n: (b, n, 0, 0)),  # embed_qk tile
        ],
        out_specs=[
            pl.BlockSpec((1, tile_n, C), lambda b, n: (b, n, 0)),        # hidden 'b n (h c)'
            pl.BlockSpec((1, H, tile_n, M), lambda b, n: (b, 0, n, 0)),  # attention scores
        ],
    )

    e_bytes = embed_qk.size * jnp.dtype(embed_qk.dtype).itemsize
    attn_bytes = B * H * N * M * jnp.dtype(attn_dtype).itemsize
    flops = 2 * B * N * M * C * (H + 2)          # pg contraction + qk^T + attn@v
    bytes_accessed = (e_bytes + (q.size + k.size + v.size + qw.size) * 4
                      + attn_bytes + B * N * C * 4)
    cost = pl.CostEstimate(flops=flops, transcendentals=B * H * N * M,
                           bytes_accessed=bytes_accessed)

    return pl.pallas_call(
        kernel,
        out_shape=(jax.ShapeDtypeStruct((B, N, C), jnp.float32),
                   jax.ShapeDtypeStruct((B, H, N, M), attn_dtype)),
        grid_spec=grid_spec,
        compiler_params=pltpu.CompilerParams(
            dimension_semantics=("parallel", "parallel"),
            vmem_limit_bytes=vmem_limit_bytes),
        cost_estimate=cost,
    )(q, k, v, qw, embed_qk)


# ------------------------------ JAX glue ----------------------------------- #
def _linear(x, w, b):
    # PyTorch nn.Linear: y = x @ W.T + b, W has shape (out_features, in_features)
    return jnp.einsum("...i,oi->...o", x, w) + b


def init_params(key, d_model):
    ks = jax.random.split(key, 8)
    scale = 1.0 / math.sqrt(d_model)

    def lin(kw, kb):
        w = jax.random.uniform(kw, (d_model, d_model), jnp.float32, -scale, scale)
        b = jax.random.uniform(kb, (d_model,), jnp.float32, -scale, scale)
        return w, b

    return {"q": lin(ks[0], ks[1]), "k": lin(ks[2], ks[3]),
            "v": lin(ks[4], ks[5]), "p": lin(ks[6], ks[7])}


def rpe_multi_head_attention(params, input_q, input_k, input_v, embed_qk, num_heads,
                             *, tile_n=None,
                             embed_dtype=jnp.bfloat16,    # bf16 HBM stream by default
                             mxu_dtype=jnp.bfloat16,      # bf16 MXU operands, f32 accum
                             attn_dtype=jnp.float32):
    """RPEMultiHeadAttention forward (base path). Returns
    (hidden_states (B, N, C), attention_scores (B, H, N, M))."""
    B, N, C = input_q.shape
    M = input_k.shape[1]
    H = num_heads
    c = C // H

    wq, bq = params["q"]
    wk, bk = params["k"]
    wv, bv = params["v"]
    wp, _bp = params["p"]   # proj_p bias is constant along the key axis -> cancels in softmax

    # q / k / v stay in the lane-dense 'b n (h c)' layout end-to-end.
    q = _linear(input_q, wq, bq)            # (B, N, C)
    k = _linear(input_k, wk, bk)            # (B, M, C)
    v = _linear(input_v, wv, bv)            # (B, M, C)

    # proj_p hoisted onto q (exact reassociation):
    #   einsum('bhnc,bhnmc->bhnm', q, proj_p(embed_qk))
    #     = einsum('bnhi,bnmi->bnhm', q_h @ Wp_h, embed_qk)  [+ q_h.bp_h, dropped]
    # -> embed_qk streams straight into the kernel, untransposed, exactly once.
    wp_heads = wp.reshape(H, c, C)                                      # Wp[h*c+cc, i]
    qw = jnp.einsum("bnhc,hci->bnhi", q.reshape(B, N, H, c), wp_heads)  # (B, N, H, C)

    # Stream the dominant operand in bf16 (halves HBM traffic); under jit in a
    # real pipeline this cast fuses into embed_qk's producer.
    # TODO(synk): fp8 (e4m3) streaming with a per-tensor scale folded into qw
    #             is worth another ~2x on v7x if the accuracy budget allows.
    if embed_dtype is not None and embed_qk.dtype != jnp.dtype(embed_dtype):
        embed_qk = embed_qk.astype(embed_dtype)

    vmem_limit, tile_budget = _vmem_budgets()
    if tile_n is None:
        e_item = jnp.dtype(embed_qk.dtype).itemsize
        attn_item = jnp.dtype(attn_dtype).itemsize
        needs_cast = (mxu_dtype is not None
                      and embed_qk.dtype != jnp.dtype(mxu_dtype))
        tile_n = _choose_tile_n(N, M, C, H, e_item, attn_item, needs_cast,
                                tile_budget, want_multi_tile=(B == 1))

    hidden, attn = _rpe_attention_core(
        q, k, v, qw, embed_qk, num_heads=H, tile_n=tile_n,
        mxu_dtype=mxu_dtype, attn_dtype=attn_dtype,
        vmem_limit_bytes=vmem_limit)
    return hidden, attn


# --------------------------- pure-JAX reference ----------------------------- #
def _reference(params, input_q, input_k, input_v, embed_qk, num_heads):
    B, N, C = input_q.shape
    M = input_k.shape[1]
    H = num_heads
    c = C // H
    q = _linear(input_q, *params["q"]).reshape(B, N, H, c).transpose(0, 2, 1, 3)
    k = _linear(input_k, *params["k"]).reshape(B, M, H, c).transpose(0, 2, 1, 3)
    v = _linear(input_v, *params["v"]).reshape(B, M, H, c).transpose(0, 2, 1, 3)
    p = _linear(embed_qk, *params["p"]).reshape(B, N, M, H, c).transpose(0, 3, 1, 2, 4)
    scores = (jnp.einsum("bhnc,bhmc->bhnm", q, k)
              + jnp.einsum("bhnc,bhnmc->bhnm", q, p)) / math.sqrt(c)
    attn = jax.nn.softmax(scores, axis=-1)
    hidden = jnp.einsum("bhnm,bhmc->bhnc", attn, v)
    return hidden.transpose(0, 2, 1, 3).reshape(B, N, C), attn


# ---------------------------------- main ------------------------------------ #
if __name__ == "__main__":
    def run_case(case_idx, B, N, M, d_model, num_heads, atol, rtol, **kw):
        key = jax.random.fold_in(jax.random.PRNGKey(0), case_idx)
        kp, kq, kk, kv, ke = jax.random.split(key, 5)
        params = init_params(kp, d_model)
        input_q = jax.random.normal(kq, (B, N, d_model), jnp.float32)
        input_k = jax.random.normal(kk, (B, M, d_model), jnp.float32)
        input_v = jax.random.normal(kv, (B, M, d_model), jnp.float32)
        embed_qk = jax.random.normal(ke, (B, N, M, d_model), jnp.float32)

        hidden, attn = rpe_multi_head_attention(
            params, input_q, input_k, input_v, embed_qk, num_heads, **kw)
        jax.block_until_ready((hidden, attn))

        ref_hidden, ref_attn = _reference(
            params, input_q, input_k, input_v, embed_qk, num_heads)
        assert hidden.shape == (B, N, d_model)
        assert attn.shape == (B, num_heads, N, M)
        assert jnp.allclose(hidden, ref_hidden, atol=atol, rtol=rtol), \
            f"hidden mismatch in case {case_idx}"
        assert jnp.allclose(attn.astype(jnp.float32), ref_attn, atol=atol, rtol=rtol), \
            f"attn mismatch in case {case_idx}"

    # Exact-f32 path (tight tolerance) — single N tile per batch.
    run_case(0, B=2, N=8, M=8, d_model=32, num_heads=4, atol=1e-4, rtol=1e-4,
             embed_dtype=jnp.float32, mxu_dtype=None)
    # Exact-f32, B=1: exercises the auto tile chooser's both-cores-get-work
    # preference (grid (1, 2)) and the VMEM-resident k/v blocks.
    run_case(1, B=1, N=64, M=48, d_model=64, num_heads=4, atol=1e-4, rtol=1e-4,
             embed_dtype=jnp.float32, mxu_dtype=None)
    # Default perf path: bf16 embed_qk stream + bf16 MXU operands (f32 accum),
    # explicit tile_n -> (2, 2) grid. Dtype-aware (looser) tolerance.
    run_case(2, B=2, N=32, M=40, d_model=64, num_heads=8, atol=3e-2, rtol=3e-2,
             tile_n=16)

    print("KERNEL_OK")
</pallas_src>

<mosaic_0001>
module attributes {stable_mosaic.version = 11 : i64} {
  func.func @_rpe_attn_kernel(%arg0: i32, %arg1: i32, %arg2: memref<1x8x32xf32, #tpu.memory_space<vmem>>, %arg3: memref<1x8x32xf32, #tpu.memory_space<vmem>>, %arg4: memref<1x8x32xf32, #tpu.memory_space<vmem>>, %arg5: memref<1x8x4x32xf32, #tpu.memory_space<vmem>>, %arg6: memref<1x8x8x32xf32, #tpu.memory_space<vmem>>, %arg7: memref<1x8x32xf32, #tpu.memory_space<vmem>>, %arg8: memref<1x4x8x8xf32, #tpu.memory_space<vmem>>) attributes {dimension_semantics = [#tpu.dimension_semantics<parallel>, #tpu.dimension_semantics<parallel>], iteration_bounds = array<i64: 2, 1>, scalar_prefetch = 0 : i64, scratch_operands = 0 : i64, tpu.core_type = #tpu.core_type<tc>, window_params = [{transform_indices = @transform_0, window_bounds = array<i64: 1, 8, 32>}, {transform_indices = @transform_1, window_bounds = array<i64: 1, 8, 32>}, {transform_indices = @transform_2, window_bounds = array<i64: 1, 8, 32>}, {transform_indices = @transform_3, window_bounds = array<i64: 1, 8, 4, 32>}, {transform_indices = @transform_4, window_bounds = array<i64: 1, 8, 8, 32>}, {transform_indices = @transform_5, window_bounds = array<i64: 1, 8, 32>}, {transform_indices = @transform_6, window_bounds = array<i64: 1, 4, 8, 8>}]} {
    %c0 = arith.constant 0 : index
    %c0_0 = arith.constant 0 : index
    %c0_1 = arith.constant 0 : index
    %c0_2 = arith.constant 0 : index
    %0 = vector.load %arg6[%c0, %c0_0, %c0_1, %c0_2] : memref<1x8x8x32xf32, #tpu.memory_space<vmem>>, vector<1x8x8x32xf32>
    %1 = vector.shape_cast %0 : vector<1x8x8x32xf32> to vector<8x8x32xf32>
    %c0_3 = arith.constant 0 : index
    %c0_4 = arith.constant 0 : index
    %c0_5 = arith.constant 0 : index
    %c0_6 = arith.constant 0 : index
    %2 = vector.load %arg5[%c0_3, %c0_4, %c0_5, %c0_6] : memref<1x8x4x32xf32, #tpu.memory_space<vmem>>, vector<1x8x4x32xf32>
    %3 = vector.shape_cast %2 : vector<1x8x4x32xf32> to vector<8x4x32xf32>
    "tpu.trace_start"() <{level = 10 : i32, message = "nhi,nmi->nhm"}> : () -> ()
    %cst = arith.constant dense<0.000000e+00> : vector<8x4x8xf32>
    %4 = tpu.matmul %3, %1, %cst {dimension_numbers = #tpu.dot_dimension_numbers<[2], [2], [1], [1], [0, 0, 0, 1, 1, 1], [0], [0]>} : vector<8x4x32xf32>, vector<8x8x32xf32>, vector<8x4x8xf32> -> vector<8x4x8xf32>
    "tpu.trace_stop"() : () -> ()
    %c0_7 = arith.constant 0 : index
    %c0_8 = arith.constant 0 : index
    %c0_9 = arith.constant 0 : index
    %5 = vector.load %arg2[%c0_7, %c0_8, %c0_9] : memref<1x8x32xf32, #tpu.memory_space<vmem>>, vector<1x8x32xf32>
    %6 = vector.shape_cast %5 : vector<1x8x32xf32> to vector<8x32xf32>
    %c0_10 = arith.constant 0 : index
    %c0_11 = arith.constant 0 : index
    %c0_12 = arith.constant 0 : index
    %7 = vector.load %arg3[%c0_10, %c0_11, %c0_12] : memref<1x8x32xf32, #tpu.memory_space<vmem>>, vector<1x8x32xf32>
    %8 = vector.shape_cast %7 : vector<1x8x32xf32> to vector<8x32xf32>
    %c0_13 = arith.constant 0 : index
    %c0_14 = arith.constant 0 : index
    %c0_15 = arith.constant 0 : index
    %9 = vector.load %arg4[%c0_13, %c0_14, %c0_15] : memref<1x8x32xf32, #tpu.memory_space<vmem>>, vector<1x8x32xf32>
    %10 = vector.shape_cast %9 : vector<1x8x32xf32> to vector<8x32xf32>
    %11 = vector.extract_strided_slice %6 {offsets = [0, 0], sizes = [8, 8], strides = [1, 1]} : vector<8x32xf32> to vector<8x8xf32>
    %12 = vector.extract_strided_slice %8 {offsets = [0, 0], sizes = [8, 8], strides = [1, 1]} : vector<8x32xf32> to vector<8x8xf32>
    %13 = vector.extract_strided_slice %10 {offsets = [0, 0], sizes = [8, 8], strides = [1, 1]} : vector<8x32xf32> to vector<8x8xf32>
    %cst_16 = arith.constant dense<0.000000e+00> : vector<8x8xf32>
    %14 = tpu.matmul %11, %12, %cst_16 {dimension_numbers = #tpu.dot_dimension_numbers<[1], [1], [0], [0], [0, 0, 1, 0], [], []>} : vector<8x8xf32>, vector<8x8xf32>, vector<8x8xf32> -> vector<8x8xf32>
    %15 = vector.extract_strided_slice %4 {offsets = [0, 0, 0], sizes = [8, 1, 8], strides = [1, 1, 1]} : vector<8x4x8xf32> to vector<8x1x8xf32>
    %16 = vector.shape_cast %15 : vector<8x1x8xf32> to vector<8x8xf32>
    %17 = arith.addf %14, %16 : vector<8x8xf32>
    %cst_17 = arith.constant 0.353553385 : f32
    %18 = vector.broadcast %cst_17 : f32 to vector<8x8xf32>
    %19 = arith.mulf %17, %18 : vector<8x8xf32>
    %cst_18 = arith.constant dense<0xFF800000> : vector<8xf32>
    %20 = vector.multi_reduction <maximumf>, %19, %cst_18 [1] : vector<8x8xf32> to vector<8xf32>
    %21 = vector.shape_cast %20 : vector<8xf32> to vector<8x1xf32>
    %22 = vector.broadcast %21 : vector<8x1xf32> to vector<8x8xf32>
    %23 = arith.subf %19, %22 : vector<8x8xf32>
    %24 = math.exp %23 : vector<8x8xf32>
    %cst_19 = arith.constant dense<0.000000e+00> : vector<8xf32>
    %25 = vector.multi_reduction <add>, %24, %cst_19 [1] : vector<8x8xf32> to vector<8xf32>
    %26 = vector.shape_cast %25 : vector<8xf32> to vector<8x1xf32>
    %27 = tpu.reciprocal %26 : vector<8x1xf32> -> vector<8x1xf32>
    %28 = vector.broadcast %27 : vector<8x1xf32> to vector<8x8xf32>
    %29 = arith.mulf %24, %28 : vector<8x8xf32>
    %c0_20 = arith.constant 0 : index
    %c0_21 = arith.constant 0 : index
    %c0_22 = arith.constant 0 : index
    %c0_23 = arith.constant 0 : index
    %30 = vector.load %arg8[%c0_20, %c0_21, %c0_22, %c0_23] : memref<1x4x8x8xf32, #tpu.memory_space<vmem>>, vector<1x1x8x8xf32>
    %31 = vector.shape_cast %30 : vector<1x1x8x8xf32> to vector<8x8xf32>
    %32 = vector.shape_cast %29 : vector<8x8xf32> to vector<1x1x8x8xf32>
    tpu.vector_store %arg8[%c0_20, %c0_21, %c0_22, %c0_23], %32 {strides = array<i32>} : memref<1x4x8x8xf32, #tpu.memory_space<vmem>>, vector<1x1x8x8xf32>,
    %cst_24 = arith.constant dense<0.000000e+00> : vector<8x8xf32>
    %33 = tpu.matmul %29, %13, %cst_24 {dimension_numbers = #tpu.dot_dimension_numbers<[1], [0], [0], [1], [0, 0, 1, 1], [], []>} : vector<8x8xf32>, vector<8x8xf32>, vector<8x8xf32> -> vector<8x8xf32>
    %c0_25 = arith.constant 0 : index
    %c0_26 = arith.constant 0 : index
    %c0_27 = arith.constant 0 : index
    %34 = vector.load %arg7[%c0_25, %c0_26, %c0_27] : memref<1x8x32xf32, #tpu.memory_space<vmem>>, vector<1x8x8xf32>
    %35 = vector.shape_cast %34 : vector<1x8x8xf32> to vector<8x8xf32>
    %36 = vector.shape_cast %33 : vector<8x8xf32> to vector<1x8x8xf32>
    tpu.vector_store %arg7[%c0_25, %c0_26, %c0_27], %36 {strides = array<i32>} : memref<1x8x32xf32, #tpu.memory_space<vmem>>, vector<1x8x8xf32>,
    %37 = vector.extract_strided_slice %6 {offsets = [0, 8], sizes = [8, 8], strides = [1, 1]} : vector<8x32xf32> to vector<8x8xf32>
    %38 = vector.extract_strided_slice %8 {offsets = [0, 8], sizes = [8, 8], strides = [1, 1]} : vector<8x32xf32> to vector<8x8xf32>
    %39 = vector.extract_strided_slice %10 {offsets = [0, 8], sizes = [8, 8], strides = [1, 1]} : vector<8x32xf32> to vector<8x8xf32>
    %cst_28 = arith.constant dense<0.000000e+00> : vector<8x8xf32>
    %40 = tpu.matmul %37, %38, %cst_28 {dimension_numbers = #tpu.dot_dimension_numbers<[1], [1], [0], [0], [0, 0, 1, 0], [], []>} : vector<8x8xf32>, vector<8x8xf32>, vector<8x8xf32> -> vector<8x8xf32>
    %41 = vector.extract_strided_slice %4 {offsets = [0, 1, 0], sizes = [8, 1, 8], strides = [1, 1, 1]} : vector<8x4x8xf32> to vector<8x1x8xf32>
    %42 = vector.shape_cast %41 : vector<8x1x8xf32> to vector<8x8xf32>
    %43 = arith.addf %40, %42 : vector<8x8xf32>
    %cst_29 = arith.constant 0.353553385 : f32
    %44 = vector.broadcast %cst_29 : f32 to vector<8x8xf32>
    %45 = arith.mulf %43, %44 : vector<8x8xf32>
    %cst_30 = arith.constant dense<0xFF800000> : vector<8xf32>
    %46 = vector.multi_reduction <maximumf>, %45, %cst_30 [1] : vector<8x8xf32> to vector<8xf32>
    %47 = vector.shape_cast %46 : vector<8xf32> to vector<8x1xf32>
    %48 = vector.broadcast %47 : vector<8x1xf32> to vector<8x8xf32>
    %49 = arith.subf %45, %48 : vector<8x8xf32>
    %50 = math.exp %49 : vector<8x8xf32>
    %cst_31 = arith.constant dense<0.000000e+00> : vector<8xf32>
    %51 = vector.multi_reduction <add>, %50, %cst_31 [1] : vector<8x8xf32> to vector<8xf32>
    %52 = vector.shape_cast %51 : vector<8xf32> to vector<8x1xf32>
    %53 = tpu.reciprocal %52 : vector<8x1xf32> -> vector<8x1xf32>
    %54 = vector.broadcast %53 : vector<8x1xf32> to vector<8x8xf32>
    %55 = arith.mulf %50, %54 : vector<8x8xf32>
    %c0_32 = arith.constant 0 : index
    %c1 = arith.constant 1 : index
    %c0_33 = arith.constant 0 : index
    %c0_34 = arith.constant 0 : index
    %56 = vector.load %arg8[%c0_32, %c1, %c0_33, %c0_34] : memref<1x4x8x8xf32, #tpu.memory_space<vmem>>, vector<1x1x8x8xf32>
    %57 = vector.shape_cast %56 : vector<1x1x8x8xf32> to vector<8x8xf32>
    %58 = vector.shape_cast %55 : vector<8x8xf32> to vector<1x1x8x8xf32>
    tpu.vector_store %arg8[%c0_32, %c1, %c0_33, %c0_34], %58 {strides = array<i32>} : memref<1x4x8x8xf32, #tpu.memory_space<vmem>>, vector<1x1x8x8xf32>,
    %cst_35 = arith.constant dense<0.000000e+00> : vector<8x8xf32>
    %59 = tpu.matmul %55, %39, %cst_35 {dimension_numbers = #tpu.dot_dimension_numbers<[1], [0], [0], [1], [0, 0, 1, 1], [], []>} : vector<8x8xf32>, vector<8x8xf32>, vector<8x8xf32> -> vector<8x8xf32>
    %c0_36 = arith.constant 0 : index
    %c0_37 = arith.constant 0 : index
    %c8 = arith.constant 8 : index
    %60 = vector.load %arg7[%c0_36, %c0_37, %c8] : memref<1x8x32xf32, #tpu.memory_space<vmem>>, vector<1x8x8xf32>
    %61 = vector.shape_cast %60 : vector<1x8x8xf32> to vector<8x8xf32>
    %62 = vector.shape_cast %59 : vector<8x8xf32> to vector<1x8x8xf32>
    tpu.vector_store %arg7[%c0_36, %c0_37, %c8], %62 {strides = array<i32>} : memref<1x8x32xf32, #tpu.memory_space<vmem>>, vector<1x8x8xf32>,
    %63 = vector.extract_strided_slice %6 {offsets = [0, 16], sizes = [8, 8], strides = [1, 1]} : vector<8x32xf32> to vector<8x8xf32>
    %64 = vector.extract_strided_slice %8 {offsets = [0, 16], sizes = [8, 8], strides = [1, 1]} : vector<8x32xf32> to vector<8x8xf32>
    %65 = vector.extract_strided_slice %10 {offsets = [0, 16], sizes = [8, 8], strides = [1, 1]} : vector<8x32xf32> to vector<8x8xf32>
    %cst_38 = arith.constant dense<0.000000e+00> : vector<8x8xf32>
    %66 = tpu.matmul %63, %64, %cst_38 {dimension_numbers = #tpu.dot_dimension_numbers<[1], [1], [0], [0], [0, 0, 1, 0], [], []>} : vector<8x8xf32>, vector<8x8xf32>, vector<8x8xf32> -> vector<8x8xf32>
    %67 = vector.extract_strided_slice %4 {offsets = [0, 2, 0], sizes = [8, 1, 8], strides = [1, 1, 1]} : vector<8x4x8xf32> to vector<8x1x8xf32>
    %68 = vector.shape_cast %67 : vector<8x1x8xf32> to vector<8x8xf32>
    %69 = arith.addf %66, %68 : vector<8x8xf32>
    %cst_39 = arith.constant 0.353553385 : f32
    %70 = vector.broadcast %cst_39 : f32 to vector<8x8xf32>
    %71 = arith.mulf %69, %70 : vector<8x8xf32>
    %cst_40 = arith.constant dense<0xFF800000> : vector<8xf32>
    %72 = vector.multi_reduction <maximumf>, %71, %cst_40 [1] : vector<8x8xf32> to vector<8xf32>
    %73 = vector.shape_cast %72 : vector<8xf32> to vector<8x1xf32>
    %74 = vector.broadcast %73 : vector<8x1xf32> to vector<8x8xf32>
    %75 = arith.subf %71, %74 : vector<8x8xf32>
    %76 = math.exp %75 : vector<8x8xf32>
    %cst_41 = arith.constant dense<0.000000e+00> : vector<8xf32>
    %77 = vector.multi_reduction <add>, %76, %cst_41 [1] : vector<8x8xf32> to vector<8xf32>
    %78 = vector.shape_cast %77 : vector<8xf32> to vector<8x1xf32>
    %79 = tpu.reciprocal %78 : vector<8x1xf32> -> vector<8x1xf32>
    %80 = vector.broadcast %79 : vector<8x1xf32> to vector<8x8xf32>
    %81 = arith.mulf %76, %80 : vector<8x8xf32>
    %c0_42 = arith.constant 0 : index
    %c2 = arith.constant 2 : index
    %c0_43 = arith.constant 0 : index
    %c0_44 = arith.constant 0 : index
    %82 = vector.load %arg8[%c0_42, %c2, %c0_43, %c0_44] : memref<1x4x8x8xf32, #tpu.memory_space<vmem>>, vector<1x1x8x8xf32>
    %83 = vector.shape_cast %82 : vector<1x1x8x8xf32> to vector<8x8xf32>
    %84 = vector.shape_cast %81 : vector<8x8xf32> to vector<1x1x8x8xf32>
    tpu.vector_store %arg8[%c0_42, %c2, %c0_43, %c0_44], %84 {strides = array<i32>} : memref<1x4x8x8xf32, #tpu.memory_space<vmem>>, vector<1x1x8x8xf32>,
    %cst_45 = arith.constant dense<0.000000e+00> : vector<8x8xf32>
    %85 = tpu.matmul %81, %65, %cst_45 {dimension_numbers = #tpu.dot_dimension_numbers<[1], [0], [0], [1], [0, 0, 1, 1], [], []>} : vector<8x8xf32>, vector<8x8xf32>, vector<8x8xf32> -> vector<8x8xf32>
    %c0_46 = arith.constant 0 : index
    %c0_47 = arith.constant 0 : index
    %c16 = arith.constant 16 : index
    %86 = vector.load %arg7[%c0_46, %c0_47, %c16] : memref<1x8x32xf32, #tpu.memory_space<vmem>>, vector<1x8x8xf32>
    %87 = vector.shape_cast %86 : vector<1x8x8xf32> to vector<8x8xf32>
    %88 = vector.shape_cast %85 : vector<8x8xf32> to vector<1x8x8xf32>
    tpu.vector_store %arg7[%c0_46, %c0_47, %c16], %88 {strides = array<i32>} : memref<1x8x32xf32, #tpu.memory_space<vmem>>, vector<1x8x8xf32>,
    %89 = vector.extract_strided_slice %6 {offsets = [0, 24], sizes = [8, 8], strides = [1, 1]} : vector<8x32xf32> to vector<8x8xf32>
    %90 = vector.extract_strided_slice %8 {offsets = [0, 24], sizes = [8, 8], strides = [1, 1]} : vector<8x32xf32> to vector<8x8xf32>
    %91 = vector.extract_strided_slice %10 {offsets = [0, 24], sizes = [8, 8], strides = [1, 1]} : vector<8x32xf32> to vector<8x8xf32>
    %cst_48 = arith.constant dense<0.000000e+00> : vector<8x8xf32>
    %92 = tpu.matmul %89, %90, %cst_48 {dimension_numbers = #tpu.dot_dimension_numbers<[1], [1], [0], [0], [0, 0, 1, 0], [], []>} : vector<8x8xf32>, vector<8x8xf32>, vector<8x8xf32> -> vector<8x8xf32>
    %93 = vector.extract_strided_slice %4 {offsets = [0, 3, 0], sizes = [8, 1, 8], strides = [1, 1, 1]} : vector<8x4x8xf32> to vector<8x1x8xf32>
    %94 = vector.shape_cast %93 : vector<8x1x8xf32> to vector<8x8xf32>
    %95 = arith.addf %92, %94 : vector<8x8xf32>
    %cst_49 = arith.constant 0.353553385 : f32
    %96 = vector.broadcast %cst_49 : f32 to vector<8x8xf32>
    %97 = arith.mulf %95, %96 : vector<8x8xf32>
    %cst_50 = arith.constant dense<0xFF800000> : vector<8xf32>
    %98 = vector.multi_reduction <maximumf>, %97, %cst_50 [1] : vector<8x8xf32> to vector<8xf32>
    %99 = vector.shape_cast %98 : vector<8xf32> to vector<8x1xf32>
    %100 = vector.broadcast %99 : vector<8x1xf32> to vector<8x8xf32>
    %101 = arith.subf %97, %100 : vector<8x8xf32>
    %102 = math.exp %101 : vector<8x8xf32>
    %cst_51 = arith.constant dense<0.000000e+00> : vector<8xf32>
    %103 = vector.multi_reduction <add>, %102, %cst_51 [1] : vector<8x8xf32> to vector<8xf32>
    %104 = vector.shape_cast %103 : vector<8xf32> to vector<8x1xf32>
    %105 = tpu.reciprocal %104 : vector<8x1xf32> -> vector<8x1xf32>
    %106 = vector.broadcast %105 : vector<8x1xf32> to vector<8x8xf32>
    %107 = arith.mulf %102, %106 : vector<8x8xf32>
    %c0_52 = arith.constant 0 : index
    %c3 = arith.constant 3 : index
    %c0_53 = arith.constant 0 : index
    %c0_54 = arith.constant 0 : index
    %108 = vector.load %arg8[%c0_52, %c3, %c0_53, %c0_54] : memref<1x4x8x8xf32, #tpu.memory_space<vmem>>, vector<1x1x8x8xf32>
    %109 = vector.shape_cast %108 : vector<1x1x8x8xf32> to vector<8x8xf32>
    %110 = vector.shape_cast %107 : vector<8x8xf32> to vector<1x1x8x8xf32>
    tpu.vector_store %arg8[%c0_52, %c3, %c0_53, %c0_54], %110 {strides = array<i32>} : memref<1x4x8x8xf32, #tpu.memory_space<vmem>>, vector<1x1x8x8xf32>,
    %cst_55 = arith.constant dense<0.000000e+00> : vector<8x8xf32>
    %111 = tpu.matmul %107, %91, %cst_55 {dimension_numbers = #tpu.dot_dimension_numbers<[1], [0], [0], [1], [0, 0, 1, 1], [], []>} : vector<8x8xf32>, vector<8x8xf32>, vector<8x8xf32> -> vector<8x8xf32>
    %c0_56 = arith.constant 0 : index
    %c0_57 = arith.constant 0 : index
    %c24 = arith.constant 24 : index
    %112 = vector.load %arg7[%c0_56, %c0_57, %c24] : memref<1x8x32xf32, #tpu.memory_space<vmem>>, vector<1x8x8xf32>
    %113 = vector.shape_cast %112 : vector<1x8x8xf32> to vector<8x8xf32>
    %114 = vector.shape_cast %111 : vector<8x8xf32> to vector<1x8x8xf32>
    tpu.vector_store %arg7[%c0_56, %c0_57, %c24], %114 {strides = array<i32>} : memref<1x8x32xf32, #tpu.memory_space<vmem>>, vector<1x8x8xf32>,
    return
  }
  func.func @transform_0(%arg0: i32, %arg1: i32) -> (i32, i32, i32) {
    %c0_i32 = arith.constant 0 : i32
    %c0_i32_0 = arith.constant 0 : i32
    return %arg0, %arg1, %c0_i32 : i32, i32, i32
  }
  func.func @transform_1(%arg0: i32, %arg1: i32) -> (i32, i32, i32) {
    %c0_i32 = arith.constant 0 : i32
    %c0_i32_0 = arith.constant 0 : i32
    %c0_i32_1 = arith.constant 0 : i32
    return %arg0, %c0_i32, %c0_i32_0 : i32, i32, i32
  }
  func.func @transform_2(%arg0: i32, %arg1: i32) -> (i32, i32, i32) {
    %c0_i32 = arith.constant 0 : i32
    %c0_i32_0 = arith.constant 0 : i32
    %c0_i32_1 = arith.constant 0 : i32
    return %arg0, %c0_i32, %c0_i32_0 : i32, i32, i32
  }
  func.func @transform_3(%arg0: i32, %arg1: i32) -> (i32, i32, i32, i32) {
    %c0_i32 = arith.constant 0 : i32
    %c0_i32_0 = arith.constant 0 : i32
    %c0_i32_1 = arith.constant 0 : i32
    return %arg0, %arg1, %c0_i32, %c0_i32_0 : i32, i32, i32, i32
  }
  func.func @transform_4(%arg0: i32, %arg1: i32) -> (i32, i32, i32, i32) {
    %c0_i32 = arith.constant 0 : i32
    %c0_i32_0 = arith.constant 0 : i32
    %c0_i32_1 = arith.constant 0 : i32
    return %arg0, %arg1, %c0_i32, %c0_i32_0 : i32, i32, i32, i32
  }
  func.func @transform_5(%arg0: i32, %arg1: i32) -> (i32, i32, i32) {
    %c0_i32 = arith.constant 0 : i32
    %c0_i32_0 = arith.constant 0 : i32
    return %arg0, %arg1, %c0_i32 : i32, i32, i32
  }
  func.func @transform_6(%arg0: i32, %arg1: i32) -> (i32, i32, i32, i32) {
    %c0_i32 = arith.constant 0 : i32
    %c0_i32_0 = arith.constant 0 : i32
    %c0_i32_1 = arith.constant 0 : i32
    return %arg0, %c0_i32, %arg1, %c0_i32_0 : i32, i32, i32, i32
  }
}

</mosaic_0001>

<bundles_post_ra>
// kernel: tpu_custom_call.1
= control target key start
LH: loop header
LB: loop body
LE: loop exit
PB: predicated region body
PF: predicated region fallthrough
CT: control target
= control target key end

     0   :  { %s3242_s0 = inlined_call_operand.hbm [shape: f32[2,8,32], index: 0, kind: input, shape index: {}]   ;;  %s3243_s1 = inlined_call_operand.hbm [shape: f32[2,8,32], index: 1, kind: input, shape index: {}]   ;;  %s3244_s2 = inlined_call_operand.hbm [shape: f32[2,8,32], index: 2, kind: input, shape index: {}]   ;;  %s3245_s3 = inlined_call_operand.hbm [shape: f32[2,8,4,32], index: 3, kind: input, shape index: {}]   ;;  %s3246_s4 = inlined_call_operand.hbm [shape: f32[2,8,8,32], index: 4, kind: input, shape index: {}]   ;;  %s3247_s5 = inlined_call_operand.hbm [shape: f32[2,8,32], index: 5, kind: output, shape index: {0}]   ;;  %s3248_s6 = inlined_call_operand.hbm [shape: f32[2,4,8,8], index: 6, kind: output, shape index: {1}]  }
   0x1   :  { %3259 = sst [smem:[#allocation24_spill]] %s3243_s1 }
   0x2   :  { %3260 = sst [smem:[#allocation25_spill]] %s3245_s3 }
   0x3   :  { %3261 = sst [smem:[#allocation26_spill]] %s3247_s5 }
   0x4   :  { %12 = vsyncpa [#allocation3], 0 }
   0x5   :  { %14 = vsyncpa [#allocation3 + $0x1], 0 }
   0x6   :  { %15 = vsyncpa [#allocation6], 0 }
   0x7   :  { %17 = vsyncpa [#allocation6 + $0x1], 0 }
   0x8   :  { %18 = vsyncpa [#allocation9], 0 }
   0x9   :  { %20 = vsyncpa [#allocation9 + $0x1], 0 }
   0xa   :  { %21 = vsyncpa [#allocation4], 0 }
   0xb   :  { %23 = vsyncpa [#allocation4 + $0x1], 0 }
   0xc   :  { %24 = vsyncpa [#allocation13], 0 }
   0xd   :  { %26 = vsyncpa [#allocation13 + $0x1], 0  ;;  %s2710_s21 = smov 0   ;;  %s2712_s22 = smov 0  }
   0xe   :  { %s2714_s23 = smov 0   ;;  %s2716_s24 = smov 0  }
   0xf   :  { %s2718_s25 = smov 0   ;;  %s2720_s26 = smov 0  }
  0x10 LB: > { %3262 = sst [smem:[#allocation19_spill]] %s2633_s21  ;;  %s2741_s27 = sadd.s32 4294967295, %s2653_s26   ;;  %s2653_s26 = sphi %s2720_s26, %s32_s26   ;;  %s2649_s25 = sphi %s2718_s25, %s3295_s25   ;;  %s2645_s24 = sphi %s2716_s24, %s3294_s24   ;;  %s2641_s23 = sphi %s2714_s23, %s3290_s23   ;;  %s2637_s22 = sphi %s2712_s22, %s3293_s22   ;;  %s2633_s21 = sphi %s2710_s21, %s3292_s21  }
  0x11   : > { %3263 = sst [smem:[#allocation20_spill]] %s2641_s23  ;;  %s2089_s28 = sadd.s32 4294967294, %s2653_s26  }
  0x12   : > { %s44_s29 = sadd.s32 1, %s2649_s25  ;;  %s53_s30 = sadd.s32 1, %s2641_s23 }
  0x13   : > { %p46_p0 = scmp.ge.s32.totalorder %s44_s29, 2  ;;  %p60_p1 = scmp.ne.s32.totalorder %s2641_s23, %s2637_s22 }
  0x14   : > { %p61_p2 = scmp.eq.s32.totalorder %s2653_s26, 0  ;;  %p66_p3 = scmp.ne.s32.totalorder %s2637_s22, %s2633_s21 }
  0x15   : > { %s3297_s29 = smov (%p46_p0, %s44_s29), 0  ;;  %p67_p5 = scmp.eq.s32.totalorder %s2741_s27, 0 }
  0x16   : > { %3264 = sst [smem:[#allocation21_spill]] %s3297_s29  ;;  %p2753_p4 = por %p61_p2, %p60_p1 }
  0x17   : > { %s48_s8 = ssub.s32 %s2649_s25, %s3297_s29  ;;  %p200_p6 = scmp.eq.s32.totalorder %s2741_s27, 1 }
  0x18   : > { %p51_p7 = scmp.eq.s32.totalorder %s48_s8, 0  ;;  %p2761_p8 = por %p67_p5, %p66_p3 }
  0x19   : > { %p2765_p9 = por %p200_p6, %p60_p1  ;;  %p206_p10 = scmp.eq.s32.totalorder %s2089_s28, 1 }
  0x1a   : > { %s3266_s9 = scalar_select %p2761_p8, 1, 0 }
  0x1b   : > { %s3267_s10 = scalar_select %p2765_p9, 1, 0 }
  0x1c   : > { %s2770_s11 = scalar_select %p51_p7, %s2641_s23, %s53_s30  }
  0x1d   : > { %p2772_p11 = por %p206_p10, %p66_p3  ;;  %p2302_p13 = scmp.lt.s32.totalorder %s2653_s26, 2 }
  0x1e   : > { %3268 = sst [smem:[#allocation22_spill]] %s2770_s11  ;;  %s2779_s13 = sand.u32 1, %s2641_s23  }
  0x1f   : > { %s3269_s12 = scalar_select %p2772_p11, 1, 0 }
  0x20   : > { %s2782_s14 = sshll.u32 %s2779_s13, 3  ;;  %s2785_s15 = sshll.u32 %s2649_s25, 7 }
  0x21   : > { %3270 = sst [smem:[#allocation23_spill]] %s3269_s12  ;;  %p2789_p0 = pnand %p2302_p13, %p2753_p4 }
  0x22   : > { %s3251_s17 = sand.u32 1, %s2653_s26   ;;  %s3272_s1 = sld [smem:[#allocation24_spill]] }
  0x23   : > { %s3271_s16 = scalar_select %p2789_p0, 1, 0 }
  0x24   : > { %s277_s28 = scalar_lea.vmem [#allocation5], %s2782_s14  ;;  %s2806_s7 = scalar_lea.sflag [#allocation6], %s3251_s17 }
  0x25   : > { %s284_s30 = sshll.u32 %s277_s28, 4  ;;  %p2812_p3 = pneg %p2789_p0  ;;  %s2801_s30 = int_to_ptr.vmem [resolvable:$true] %s284_s30 }
  0x28   : > { %s2798_s20 = scalar_lea.hbm %s3272_s1, %s2785_s15  ;;  %s2386_s28 = scalar_lea.hbm %s3272_s1, 256 }
  0x29   : > { %s2381_s8 = scalar_lea.hbm %s2798_s20, 128  ;;  %p2387_p6 = scmp.lt.u32.totalorder %s2798_s20, %s3272_s1 }
  0x2a   : > { %p2382_p2 = scmp.ne.s32.totalorder %s2798_s20, %s2381_s8  ;;  %p2388_p7 = scmp.lt.u32.totalorder %s2386_s28, %s2381_s8 }
  0x2b   : > { %p2390_p13 = scmp.lt.u32.totalorder %s2381_s8, %s2798_s20 }
  0x2c   : > { %p2384_p4 = pnand %p2812_p3, %p2382_p2  ;;  %p2389_p10 = por %p2388_p7, %p2387_p6 }
  0x2e   : > { %p2385_p5 = pneg %p2384_p4  ;;  %p2391_p12 = por %p2390_p13, %p2389_p10 }
  0x30   : > { %p2392_p1 = pnand %p2391_p12, %p2385_p5 }
  0x32   : > { %2395 = shalt.err (!%p2392_p1)
}
  0x33   : > { %s2396_s17 = scalar_lea.vmem %s2801_s30, 128  ;;  %s2655_s18 = smov [#allocation5]  }
  0x34   : > { %p2397_p2 = scmp.ne.s32.totalorder %s2801_s30, %s2396_s17  ;;  %s2401_s19 = sshll.u32 %s2655_s18, 4  ;;  %s2402_s19 = int_to_ptr.vmem [resolvable:$false] %s2401_s19 }
  0x35   : > { %s2403_s23 = scalar_lea.vmem %s2402_s19, 256  ;;  %p2404_p9 = scmp.lt.s32.totalorder %s2801_s30, %s2402_s19 }
  0x36   : > { %p2399_p4 = pnand %p2397_p2, %p2812_p3  ;;  %p2405_p8 = scmp.lt.s32.totalorder %s2403_s23, %s2396_s17 }
  0x38   : > { %p2400_p11 = pneg %p2399_p4  ;;  %p2406_p6 = por %p2405_p8, %p2404_p9 }
  0x3a   : > { %p2407_p7 = pnand %p2406_p6, %p2400_p11 }
  0x3c   : > { %2410 = shalt.err (!%p2407_p7)
}
  0x3d   : > { %2285 = dma.hbm_to_vmem [thread:$0]  (!%p2789_p0), %s2798_s20, 128, %s2801_s30, %s2806_s7  }
  0x3e   : > { %p353_p12 = scmp.lt.s32.totalorder %s2653_s26, 3  ;;  %s2098_s11 = sshll.u32 %s2779_s13, 5 }
  0x3f   : > { %s2150_s8 = sshll.u32 %s2649_s25, 9  ;;  %p3274_p1 = scmp.ge.s32.totalorder %s2653_s26, 1 }
  0x40   : > { %s3276_s3 = sld [smem:[#allocation25_spill]]  ;;  %s313_s23 = scalar_lea.vmem [#allocation8], %s2098_s11 }
  0x41   : > { %p2841_p5 = pnand %p3274_p1, %p353_p12  ;;  %s322_s1 = sshll.u32 %s313_s23, 4  ;;  %s2850_s1 = int_to_ptr.vmem [resolvable:$true] %s322_s1 }
  0x42   : > { %s3277_s20 = sand.u32 1, %s2653_s26  }
  0x43   : > { %s3275_s17 = scalar_select %p2841_p5, 1, 0 }
  0x44   : > { %s2854_s30 = scalar_lea.sflag [#allocation9], %s3277_s20 }
  0x46   : > { %s2848_s19 = scalar_lea.hbm %s3276_s3, %s2150_s8  ;;  %s2416_s8 = scalar_lea.hbm %s3276_s3, 1024 }
  0x47   : > { %s2411_s12 = scalar_lea.hbm %s2848_s19, 512  ;;  %p2417_p10 = scmp.lt.u32.totalorder %s2848_s19, %s3276_s3 }
  0x48   : > { %p2412_p8 = scmp.ne.s32.totalorder %s2848_s19, %s2411_s12  ;;  %p2418_p13 = scmp.lt.u32.totalorder %s2416_s8, %s2411_s12 }
  0x49   : > { %p2420_p4 = scmp.lt.u32.totalorder %s2411_s12, %s2848_s19 }
  0x4a   : > { %p2414_p9 = pnand %p2412_p8, %p2812_p3  ;;  %p2419_p2 = por %p2418_p13, %p2417_p10 }
  0x4c   : > { %p2415_p11 = pneg %p2414_p9  ;;  %p2421_p6 = por %p2420_p4, %p2419_p2 }
  0x4e   : > { %p2422_p7 = pnand %p2421_p6, %p2415_p11 }
  0x50   : > { %2425 = shalt.err (!%p2422_p7)
}
  0x51   : > { %s2426_s11 = scalar_lea.vmem %s2850_s1, 512  ;;  %s2656_s21 = smov [#allocation8]  }
  0x52   : > { %p2427_p12 = scmp.ne.s32.totalorder %s2850_s1, %s2426_s11  ;;  %s2431_s23 = sshll.u32 %s2656_s21, 4  ;;  %s2432_s23 = int_to_ptr.vmem [resolvable:$false] %s2431_s23 }
  0x53   : > { %s2433_s5 = scalar_lea.vmem %s2432_s23, 1024  ;;  %p2434_p9 = scmp.lt.s32.totalorder %s2850_s1, %s2432_s23 }
  0x54   : > { %p2429_p1 = pnand %p2427_p12, %p2812_p3  ;;  %p2435_p5 = scmp.lt.s32.totalorder %s2433_s5, %s2426_s11 }
  0x56   : > { %p2430_p8 = pneg %p2429_p1  ;;  %p2436_p10 = por %p2435_p5, %p2434_p9 }
  0x58   : > { %p2437_p13 = pnand %p2436_p10, %p2430_p8 }
  0x5a   : > { %2440 = shalt.err (!%p2437_p13)
}
  0x5b   : > { %s2657_s12 = smov 64   ;;  %s2658_s20 = smov 4  }
  0x5c   : > { %2291 = dma.hbm_to_vmem [thread:$0]  (!%p2789_p0), %s2848_s19, 512, %s2850_s1, %s2854_s30, %s2657_s12, %s2657_s12, %s2658_s20  }
  0x5d   : > { %s2882_s18 = scalar_lea.hbm %s3242_s0, %s2785_s15  ;;  %s258_s11 = scalar_lea.vmem [#allocation2], %s2782_s14 }
  0x5e   : > { %s266_s21 = sshll.u32 %s258_s11, 4  ;;  %s255_s23 = scalar_lea.sflag [#allocation3], %s2779_s13  ;;  %s267_s21 = int_to_ptr.vmem [resolvable:$true] %s266_s21 }
  0x5f   : > { %s2441_s5 = scalar_lea.hbm %s2882_s18, 128  ;;  %s2446_s19 = scalar_lea.hbm %s3242_s0, 256 }
  0x60   : > { %p2442_p5 = scmp.ne.s32.totalorder %s2882_s18, %s2441_s5  ;;  %p2447_p4 = scmp.lt.u32.totalorder %s2882_s18, %s3242_s0 }
  0x61   : > { %p2448_p6 = scmp.lt.u32.totalorder %s2446_s19, %s2441_s5  ;;  %p2450_p12 = scmp.lt.u32.totalorder %s2441_s5, %s2882_s18 }
  0x62   : > { %p2444_p11 = pnand %p2442_p5, %p2812_p3 }
  0x63   : > { %p2449_p7 = por %p2448_p6, %p2447_p4 }
  0x64   : > { %p2445_p2 = pneg %p2444_p11 }
  0x65   : > { %p2451_p1 = por %p2450_p12, %p2449_p7 }
  0x67   : > { %p2452_p8 = pnand %p2451_p1, %p2445_p2 }
  0x69   : > { %2455 = shalt.err (!%p2452_p8)
}
  0x6a   : > { %s2456_s28 = scalar_lea.vmem %s267_s21, 128  ;;  %s2659_s8 = smov [#allocation2]  }
  0x6b   : > { %p2457_p9 = scmp.ne.s32.totalorder %s267_s21, %s2456_s28  ;;  %s2461_s11 = sshll.u32 %s2659_s8, 4  ;;  %s2462_s11 = int_to_ptr.vmem [resolvable:$false] %s2461_s11 }
  0x6c   : > { %s2463_s3 = scalar_lea.vmem %s2462_s11, 256  ;;  %p2464_p5 = scmp.lt.s32.totalorder %s267_s21, %s2462_s11 }
  0x6d   : > { %p2459_p10 = pnand %p2457_p9, %p2812_p3  ;;  %p2465_p11 = scmp.lt.s32.totalorder %s2463_s3, %s2456_s28 }
  0x6f   : > { %p2460_p13 = pneg %p2459_p10  ;;  %p2466_p0 = por %p2465_p11, %p2464_p5 }
  0x71   : > { %p2467_p4 = pnand %p2466_p0, %p2460_p13 }
  0x73   : > { %2470 = shalt.err (!%p2467_p4)
}
  0x74   : > { %p3278_p6 = scmp.ne.s32.totalorder %s3271_s16, 0  ;;  %s2907_s19 = scalar_lea.hbm %s3244_s2, %s2785_s15 }
  0x75   : > { %s295_s12 = scalar_lea.vmem [#allocation7], %s2782_s14  ;;  %s2101_s28 = sshll.u32 %s2779_s13, 6 }
  0x76   : > { %2282 = dma.hbm_to_vmem [thread:$0]  (!%p3278_p6), %s2882_s18, 128, %s267_s21, %s255_s23  }
  0x77   : > { %s302_s20 = sshll.u32 %s295_s12, 4  ;;  %s2471_s8 = scalar_lea.hbm %s2907_s19, 128  ;;  %s303_s20 = int_to_ptr.vmem [resolvable:$true] %s302_s20 }
  0x78   : > { %p2472_p0 = scmp.ne.s32.totalorder %s2907_s19, %s2471_s8  ;;  %s2476_s21 = scalar_lea.hbm %s3244_s2, 256 }
  0x79   : > { %p2477_p12 = scmp.lt.u32.totalorder %s2907_s19, %s3244_s2  ;;  %p2478_p1 = scmp.lt.u32.totalorder %s2476_s21, %s2471_s8 }
  0x7a   : > { %p2474_p2 = pnand %p2472_p0, %p2812_p3  ;;  %p2480_p9 = scmp.lt.u32.totalorder %s2471_s8, %s2907_s19 }
  0x7b   : > { %p2479_p8 = por %p2478_p1, %p2477_p12 }
  0x7c   : > { %p2475_p7 = pneg %p2474_p2 }
  0x7d   : > { %p2481_p10 = por %p2480_p9, %p2479_p8 }
  0x7f   : > { %p2482_p13 = pnand %p2481_p10, %p2475_p7 }
  0x81   : > { %2485 = shalt.err (!%p2482_p13)
}
  0x82   : > { %s2486_s14 = scalar_lea.vmem %s303_s20, 128  ;;  %s2660_s3 = smov [#allocation7]  }
  0x83   : > { %p2487_p5 = scmp.ne.s32.totalorder %s303_s20, %s2486_s14  ;;  %s2491_s5 = sshll.u32 %s2660_s3, 4  ;;  %s2492_s5 = int_to_ptr.vmem [resolvable:$false] %s2491_s5 }
  0x84   : > { %s2493_s1 = scalar_lea.vmem %s2492_s5, 256  ;;  %p2494_p0 = scmp.lt.s32.totalorder %s303_s20, %s2492_s5 }
  0x85   : > { %p2489_p11 = pnand %p2487_p5, %p2812_p3  ;;  %p2495_p2 = scmp.lt.s32.totalorder %s2493_s1, %s2486_s14 }
  0x87   : > { %p2490_p4 = pneg %p2489_p11  ;;  %p2496_p6 = por %p2495_p2, %p2494_p0 }
  0x89   : > { %p2497_p1 = pnand %p2496_p6, %p2490_p4 }
  0x8b   : > { %2500 = shalt.err (!%p2497_p1)
}
  0x8c   : > { %p3279_p12 = scmp.ne.s32.totalorder %s3271_s16, 0  ;;  %s2151_s12 = sshll.u32 %s2649_s25, 10 }
  0x8d   : > { %s2933_s18 = scalar_lea.hbm %s3246_s4, %s2151_s12  ;;  %s336_s21 = scalar_lea.vmem [#allocation10], %s2101_s28 }
  0x8e   : > { %2288 = dma.hbm_to_vmem [thread:$0]  (!%p3279_p12), %s2907_s19, 128, %s303_s20, %s2806_s7  }
  0x8f   : > { %s345_s23 = sshll.u32 %s336_s21, 4  ;;  %s2501_s15 = scalar_lea.hbm %s2933_s18, 1024  ;;  %s2937_s23 = int_to_ptr.vmem [resolvable:$true] %s345_s23 }
  0x90   : > { %p2502_p6 = scmp.ne.s32.totalorder %s2933_s18, %s2501_s15  ;;  %s2506_s20 = scalar_lea.hbm %s3246_s4, 2048 }
  0x91   : > { %p2507_p9 = scmp.lt.u32.totalorder %s2933_s18, %s3246_s4  ;;  %p2508_p10 = scmp.lt.u32.totalorder %s2506_s20, %s2501_s15 }
  0x92   : > { %p2504_p7 = pnand %p2502_p6, %p2812_p3  ;;  %p2510_p5 = scmp.lt.u32.totalorder %s2501_s15, %s2933_s18 }
  0x93   : > { %p2509_p13 = por %p2508_p10, %p2507_p9 }
  0x94   : > { %p2505_p8 = pneg %p2504_p7 }
  0x95   : > { %p2511_p11 = por %p2510_p5, %p2509_p13 }
  0x97   : > { %p2512_p4 = pnand %p2511_p11, %p2505_p8 }
  0x99   : > { %2515 = shalt.err (!%p2512_p4)
}
  0x9a   : > { %s2516_s13 = scalar_lea.vmem %s2937_s23, 1024  ;;  %s2661_s28 = smov [#allocation10]  }
  0x9b   : > { %p2517_p0 = scmp.ne.s32.totalorder %s2937_s23, %s2516_s13  ;;  %s2521_s5 = sshll.u32 %s2661_s28, 4  ;;  %s2522_s5 = int_to_ptr.vmem [resolvable:$false] %s2521_s5 }
  0x9c   : > { %s2523_s1 = scalar_lea.vmem %s2522_s5, 2048  ;;  %p2524_p6 = scmp.lt.s32.totalorder %s2937_s23, %s2522_s5 }
  0x9d   : > { %p2519_p2 = pnand %p2517_p0, %p2812_p3  ;;  %p2525_p7 = scmp.lt.s32.totalorder %s2523_s1, %s2516_s13 }
  0x9f   : > { %p2520_p1 = pneg %p2519_p2  ;;  %p2526_p9 = por %p2525_p7, %p2524_p6 }
  0xa1   : > { %p2527_p10 = pnand %p2526_p9, %p2520_p1 }
  0xa3   : > { %2530 = shalt.err (!%p2527_p10)
}
  0xa4   : > { %s2662_s12 = smov 128   ;;  %s2663_s8 = smov 8  }
  0xa5   : > { %2294 = dma.hbm_to_vmem [thread:$0]  (!%p3279_p12), %s2933_s18, 1024, %s2937_s23, %s2854_s30, %s2662_s12, %s2662_s12, %s2663_s8  }
  0xa6   : > { %p3280_p3 = scmp.ne.s32.totalorder %s3275_s17, 0 }
  0xa7   : > { %s2964_s29 = sand.u32 (!%p3280_p3), 1, %s2637_s22   ;;  %p3281_p8 = scmp.ne.s32.totalorder (!%p3280_p3), %s3266_s9, 0 }
  0xa8   : > { %357 = sbr.rel (%p3280_p3) target bundleno = 1191 (0x4a7), region = 40  ;;  %s2967_s11 = sshll.u32 (!%p3280_p3), %s2964_s29, 3 }
  0xa9   : > { %s360_s21 = scalar_lea.sflag (!%p3280_p3), [#allocation3], %s2964_s29  ;;  %s363_s15 = scalar_lea.vmem (!%p3280_p3), [#allocation2], %s2967_s11 }
  0xaf   : > { %2612 = dma.done.wait (%p3281_p8), %s360_s21, 128  }
  0xb0   : > { %2614 = vsyncadd (%p3281_p8), %s360_s21, 4294967168  ;;  %s368_s16 = sand.u32 1, %s2741_s27   ;;  %s372_s30 = scalar_lea.vmem [#allocation5], %s2967_s11 }
  0xb1   : > { %s369_s17 = scalar_lea.sflag [#allocation6], %s368_s16 }
  0xb2   : > { %2616 = dma.done.wait (%p3281_p8), %s369_s17, 256  }
  0xb3   : > { %2618 = vsyncadd (%p3281_p8), %s369_s17, 4294967040  ;;  %s2108_s18 = sshll.u32 %s2964_s29, 5  ;;  %s381_s23 = scalar_lea.vmem [#allocation7], %s2967_s11 }
  0xb4   : > { %s387_s7 = scalar_lea.sflag [#allocation9], %s368_s16  ;;  %s2985_s19 = scalar_lea.vmem [#allocation8], %s2108_s18 }
  0xb5   : > { %2620 = dma.done.wait (%p3281_p8), %s387_s7, 1536  }
  0xb6   : > { %2622 = vsyncadd (%p3281_p8), %s387_s7, 4294965760  ;;  %v2664_v0 = vmov 0.0   ;;  %s2109_s27 = sshll.u32 %s2964_s29, 6  ;;  %vm2665_vm0 = vmmov 0   ;;  %vm471_vm1 = vcmask 261120   ;;  %v1081_v1 = vld [vmem:[%s372_s30] sm:$0xff] }
  0xb7   : > { %2185 = vmatprep.subr.mxu0 %v2664_v0  ;;  %2190 = vmatprep.subr.mxu1 %v2664_v0  ;;  %s2998_s9 = scalar_lea.vmem [#allocation10], %s2109_s27  ;;  %s2666_s20 = smov 120   ;;  %v463_v4 = vld [vmem:[%s2985_s19] sm:$0xf]  ;;  %v1080_v5 = vld [vmem:[%s363_s15] sm:$0xff]  ;;  %vm1113_vm2 = vcmask 64512  }
  0xb8   : > { %2187 = vmatprep.mubr.msk.f32.mxu0 %vm2665_vm0, %v2664_v0  ;;  %2192 = vmatprep.mubr.msk.f32.mxu1 %vm2665_vm0, %v2664_v0  ;;  %v455_v2 = vld [vmem:[%s2998_s9] sm:$0xff]  ;;  %v456_v3 = vld [vmem:[%s2998_s9 + $0x8] sm:$0xff]  ;;  %s2667_s14 = smov 112   ;;  %v457_v7 = vld [vmem:[%s2998_s9 + $0x10] sm:$0xff]  ;;  %s2668_s3 = smov 104   ;;  %vm1092_vm3 = vcmask 1041409  }
  0xb9   : > { %1279 = vrot.lane.b32.xlu0 %v1081_v1, %s2666_s20  ;;  %2186 = vmatpush3.xpose.msk.msra.mxu0 %vm471_vm1, %v455_v2  ;;  %v464_v6 = vld [vmem:[%s2985_s19 + $0x4] sm:$0xf]  ;;  %v458_v8 = vld [vmem:[%s2998_s9 + $0x18] sm:$0xff]  ;;  %v465_v9 = vld [vmem:[%s2985_s19 + $0x8] sm:$0xf]  ;;  %vm1095_vm4 = vcmask 1042434  }
  0xba   : > { %2191 = vmatpush3.xpose.msk.msra.mxu1 %vm471_vm1, %v456_v3  ;;  %2195 = vmatprep.subr.mxu0 %v2664_v0  ;;  %v466_v10 = vld [vmem:[%s2985_s19 + $0xc] sm:$0xf]  ;;  %v459_v11 = vld [vmem:[%s2998_s9 + $0x20] sm:$0xff]  ;;  %v467_v13 = vld [vmem:[%s2985_s19 + $0x10] sm:$0xf]  ;;  %vm1098_vm5 = vcmask 1043459  }
  0xbb   : > { %1469 = vrot.lane.b32.xlu1 %v1081_v1, %s2667_s14  ;;  %2200 = vmatprep.subr.mxu1 %v2664_v0  ;;  %v460_v12 = vld [vmem:[%s2998_s9 + $0x28] sm:$0xff]  ;;  %v461_v14 = vld [vmem:[%s2998_s9 + $0x30] sm:$0xff]  ;;  %v462_v16 = vld [vmem:[%s2998_s9 + $0x38] sm:$0xff]  ;;  %vm1101_vm6 = vcmask 1044484   ;;  %vm1104_vm7 = vcmask 1045509   ;;  %vm1107_vm8 = vcmask 1046534  }
  0xbc   : > { %2188 = vmatmul.mubr.msk.f32.vlgmr.msra.gmra.mrb[0].mxu0 %vm471_vm1, %v463_v4  ;;  %v468_v15 = vld [vmem:[%s2985_s19 + $0x14] sm:$0xf]  ;;  %v469_v17 = vld [vmem:[%s2985_s19 + $0x18] sm:$0xf]  ;;  %v470_v18 = vld [vmem:[%s2985_s19 + $0x1c] sm:$0xf] }
  0xbd   : > { %1277 = vrot.lane.b32.xlu0 %v1080_v5, %s2666_s20  ;;  %2193 = vmatmul.mubr.msk.f32.vlgmr.msra.gmra.mrb[0].mxu1 %vm471_vm1, %v464_v6  ;;  %v3083_v36 = vld [vmem:[%s381_s23] sm:$0xff]  ;;  %vm1110_vm9 = vcmask 1047559   ;;  %s3123_s13 = scalar_lea.vmem [#allocation12], %s2108_s18  ;;  %s3146_s28 = scalar_lea.vmem [#allocation11], %s2967_s11 }
  0xbe   : > { %2196 = vmatpush3.xpose.msk.msra.mxu0 %vm471_vm1, %v457_v7  ;;  %2201 = vmatpush3.xpose.msk.msra.mxu1 %vm471_vm1, %v458_v8  ;;  %s2152_s5 = sshll.u32 %s2645_s24, 9  ;;  %s1879_s1 = sshll.u32 %s3123_s13, 4  ;;  %s3158_s1 = int_to_ptr.vmem [resolvable:$true] %s1879_s1 }
  0xbf   : > { %2197 = vmatprep.mubr.msk.f32.mxu0 %vm2665_vm0, %v2664_v0  ;;  %2202 = vmatprep.mubr.msk.f32.mxu1 %vm2665_vm0, %v2664_v0  ;;  %s2669_s12 = smov 8   ;;  %s3156_s15 = scalar_lea.hbm %s3248_s6, %s2152_s5 }
  0xc0   : > { %2205 = vmatprep.subr.mxu0 %v2664_v0  ;;  %1467 = vrot.lane.b32.xlu1 %v1080_v5, %s2667_s14  ;;  %s1851_s11 = scalar_lea.sflag [#allocation13], %s2964_s29  ;;  %s2531_s16 = scalar_lea.vmem %s3158_s1, 512 }
  0xc1   : > { %2198 = vmatmul.mubr.msk.f32.vlgmr.msra.gmra.mrb[2].mxu0 %vm471_vm1, %v465_v9  ;;  %1658 = vrot.lane.b32.xlu0 %v1081_v1, %s2668_s3  ;;  %p2532_p12 = scmp.ne.s32.totalorder %s3158_s1, %s2531_s16  ;;  %p3282_p13 = scmp.ne.s32.totalorder %s3267_s10, 0 }
  0xc2   : > { %2203 = vmatmul.mubr.msk.f32.vlgmr.msra.gmra.mrb[2].mxu1 %vm471_vm1, %v466_v10  ;;  %2206 = vmatpush3.xpose.msk.msra.mxu0 %vm471_vm1, %v459_v11  ;;  %s2670_s17 = smov [#allocation12]  }
  0xc3   : > { %2210 = vmatprep.subr.mxu1 %v2664_v0  ;;  %2207 = vmatprep.mubr.msk.f32.mxu0 %vm2665_vm0, %v2664_v0  ;;  %p2533_p5 = pnand %p2532_p12, %p3282_p13  ;;  %s2535_s30 = sshll.u32 %s2670_s17, 4  ;;  %s2536_s30 = int_to_ptr.vmem [resolvable:$false] %s2535_s30 }
  0xc4   : > { %2211 = vmatpush3.xpose.msk.msra.mxu1 %vm471_vm1, %v460_v12  ;;  %2212 = vmatprep.mubr.msk.f32.mxu1 %vm2665_vm0, %v2664_v0  ;;  %s2537_s18 = scalar_lea.vmem %s2536_s30, 1024  ;;  %p2538_p4 = scmp.lt.s32.totalorder %s3158_s1, %s2536_s30 }
  0xc5   : > { %2208 = vmatmul.mubr.msk.f32.vlgmr.msra.gmra.mrb[4].mxu0 %vm471_vm1, %v467_v13  ;;  %2215 = vmatprep.subr.mxu0 %v2664_v0  ;;  %p2534_p11 = pneg %p2533_p5  ;;  %p2539_p0 = scmp.lt.s32.totalorder %s2537_s18, %s2531_s16 }
  0xc6   : > { %1656 = vrot.lane.b32.xlu1 %v1080_v5, %s2668_s3  ;;  %2216 = vmatpush3.xpose.msk.msra.mxu0 %vm471_vm1, %v461_v14 }
  0xc7   : > { %2213 = vmatmul.mubr.msk.f32.vlgmr.msra.gmra.mrb[4].mxu1 %vm471_vm1, %v468_v15  ;;  %2220 = vmatprep.subr.mxu1 %v2664_v0  ;;  %p2540_p2 = por %p2539_p0, %p2538_p4 }
  0xc8   : > { %2221 = vmatpush3.xpose.msk.msra.mxu1 %vm471_vm1, %v462_v16  ;;  %2217 = vmatprep.mubr.msk.f32.mxu0 %vm2665_vm0, %v2664_v0 }
  0xc9   : > { %2218 = vmatmul.mubr.msk.f32.vlgmr.msra.gmra.mrb[6].mxu0 %vm471_vm1, %v469_v17  ;;  %2222 = vmatprep.mubr.msk.f32.mxu1 %vm2665_vm0, %v2664_v0  ;;  %p2541_p1 = pnand %p2540_p2, %p2534_p11 }
  0xca   : > { %2225 = vmatprep.subr.mxu0 %v2664_v0  ;;  %2227 = vmatprep.mubr.msk.f32.mxu0 %vm2665_vm0, %v2664_v0 }
  0xcb   : > { %2223 = vmatmul.mubr.msk.f32.vlgmr.msra.gmra.mrb[6].mxu1 %vm471_vm1, %v470_v18  ;;  %2226 = vmatpush3.xpose.msk.msra.mxu0 %vm1113_vm2, %v1081_v1 }
  0xcc   : > { %2235 = vmatprep.subr.mxu0 %v2664_v0  ;;  %2230 = vmatprep.subr.mxu1 %v2664_v0 }
  0xcd   : > { %2232 = vmatprep.mubr.msk.f32.mxu1 %vm2665_vm0, %v2664_v0  ;;  %2231 = vmatpush3.msra.mxu1 %v3083_v36 }
  0xce   : > { %2228 = vmatmul.mubr.msk.f32.vlgmr.msra.gmra.mrb[8].mxu0 %vm1113_vm2, %v1080_v5  ;;  %2240 = vmatprep.subr.mxu1 %v2664_v0 }
  0xcf   : > { %2237 = vmatprep.mubr.msk.f32.mxu0 %vm2665_vm0, %v2664_v0 }
 0x12b   : > { %v1280_v19 = vpop.permute.xlu0 %1279 }
 0x12c   : > { %2236 = vmatpush3.xpose.msk.msra.mxu0 %vm1113_vm2, %v1280_v19 }
 0x12d   : > { %v1470_v20 = vpop.permute.xlu1 %1469  ;;  %2245 = vmatprep.subr.mxu0 %v2664_v0 }
 0x12f   : > { %v1278_v21 = vpop.permute.xlu0 %1277 }
 0x130   : > { %2238 = vmatmul.mubr.msk.f32.vlgmr.msra.gmra.mrb[10].mxu0 %vm1113_vm2, %v1278_v21 }
 0x131   : > { %2246 = vmatpush3.xpose.msk.msra.mxu0 %vm1113_vm2, %v1470_v20  ;;  %2247 = vmatprep.mubr.msk.f32.mxu0 %vm2665_vm0, %v2664_v0 }
 0x132   : > { %v1468_v22 = vpop.permute.xlu1 %1467  ;;  %2255 = vmatprep.subr.mxu0 %v2664_v0 }
 0x133   : > { %v1659_v23 = vpop.permute.xlu0 %1658 }
 0x134   : > { %2248 = vmatmul.mubr.msk.f32.vlgmr.msra.gmra.mrb[12].mxu0 %vm1113_vm2, %v1468_v22 }
 0x135   : > { %2256 = vmatpush3.xpose.msk.msra.mxu0 %vm1113_vm2, %v1659_v23  ;;  %2257 = vmatprep.mubr.msk.f32.mxu0 %vm2665_vm0, %v2664_v0 }
 0x138   : > { %v1657_v24 = vpop.permute.xlu1 %1656 }
 0x139   : > { %2258 = vmatmul.mubr.msk.f32.vlgmr.msra.gmra.mrb[14].mxu0 %vm1113_vm2, %v1657_v24 }
 0x18f   : > { %v544_v25 = vpop.f32.mrb[0].mxu0 }
 0x190   : > { %v1281_v26 = vrot.slane %v544_v25, 1  ;;  %v1471_v27 = vrot.slane %v544_v25, 2  ;;  %v1660_v28 = vrot.slane %v544_v25, 3  ;;  %v2189_v29 = vpop.f32.mrb[1].mxu0  ;;  %v620_v30 = vpop.f32.mrb[0].mxu1 }
 0x191   : > { %v1091_v31 = vrot.slane %v620_v30, 7  ;;  %v1472_v32 = vrot.slane %v620_v30, 1  ;;  %v1661_v33 = vrot.slane %v620_v30, 2  ;;  %v2194_v34 = vpop.f32.mrb[1].mxu1 }
 0x192   : > { %v1282_v35 = vsel %vm1092_vm3, %v620_v30, %v1281_v26 }
 0x193   : > { %v1093_v37 = vsel %vm1092_vm3, %v1091_v31, %v544_v25  ;;  %v1473_v38 = vsel %vm1092_vm3, %v1472_v32, %v1471_v27  ;;  %v1662_v39 = vsel %vm1092_vm3, %v1661_v33, %v1660_v28 }
 0x194   : > { %v696_v40 = vpop.f32.mrb[2].mxu0 }
 0x195   : > { %v1094_v41 = vrot.slane %v696_v40, 6  ;;  %v1283_v42 = vrot.slane %v696_v40, 7  ;;  %v1474_v43 = vsel %vm1095_vm4, %v696_v40, %v1473_v38  ;;  %v1663_v44 = vrot.slane %v696_v40, 1  ;;  %v2199_v45 = vpop.f32.mrb[3].mxu0  ;;  %v772_v46 = vpop.f32.mrb[2].mxu1 }
 0x196   : > { %v1097_v47 = vrot.slane %v772_v46, 5  ;;  %v1285_v48 = vrot.slane %v772_v46, 6  ;;  %v1475_v49 = vrot.slane %v772_v46, 7  ;;  %v2204_v50 = vpop.f32.mrb[3].mxu1 }
 0x197   : > { %v1096_v51 = vsel %vm1095_vm4, %v1094_v41, %v1093_v37  ;;  %v1284_v52 = vsel %vm1095_vm4, %v1283_v42, %v1282_v35  ;;  %v1664_v53 = vsel %vm1095_vm4, %v1663_v44, %v1662_v39 }
 0x198   : > { %v1099_v54 = vsel %vm1098_vm5, %v1097_v47, %v1096_v51  ;;  %v1286_v55 = vsel %vm1098_vm5, %v1285_v48, %v1284_v52  ;;  %v1476_v56 = vsel %vm1098_vm5, %v1475_v49, %v1474_v43  ;;  %v1665_v57 = vsel %vm1098_vm5, %v772_v46, %v1664_v53  ;;  %v848_v58 = vpop.f32.mrb[4].mxu0 }
 0x199   : > { %v1100_v59 = vrot.slane %v848_v58, 4  ;;  %v1287_v60 = vrot.slane %v848_v58, 5  ;;  %v1477_v61 = vrot.slane %v848_v58, 6  ;;  %v1666_v62 = vrot.slane %v848_v58, 7  ;;  %v2209_v63 = vpop.f32.mrb[5].mxu0 }
 0x19a   : > { %v924_v1 = vpop.f32.mrb[4].mxu1 }
 0x19b   : > { %v1103_v2 = vrot.slane %v924_v1, 3  ;;  %v1289_v3 = vrot.slane %v924_v1, 4  ;;  %v1479_v4 = vrot.slane %v924_v1, 5  ;;  %v1668_v5 = vrot.slane %v924_v1, 6  ;;  %v2214_v6 = vpop.f32.mrb[5].mxu1 }
 0x19c   : > { %v1000_v7 = vpop.f32.mrb[6].mxu0  ;;  %v1102_v8 = vsel %vm1101_vm6, %v1100_v59, %v1099_v54  ;;  %v1288_v9 = vsel %vm1101_vm6, %v1287_v60, %v1286_v55  ;;  %v1478_v10 = vsel %vm1101_vm6, %v1477_v61, %v1476_v56  ;;  %v1667_v11 = vsel %vm1101_vm6, %v1666_v62, %v1665_v57 }
 0x19d   : > { %v1106_v12 = vrot.slane %v1000_v7, 2  ;;  %v1291_v13 = vrot.slane %v1000_v7, 3  ;;  %v1481_v14 = vrot.slane %v1000_v7, 4  ;;  %v1670_v15 = vrot.slane %v1000_v7, 5  ;;  %v2219_v16 = vpop.f32.mrb[7].mxu0 }
 0x19e   : > { %v1076_v17 = vpop.f32.mrb[6].mxu1  ;;  %v1105_v18 = vsel %vm1104_vm7, %v1103_v2, %v1102_v8  ;;  %v1290_v19 = vsel %vm1104_vm7, %v1289_v3, %v1288_v9  ;;  %v1480_v20 = vsel %vm1104_vm7, %v1479_v4, %v1478_v10  ;;  %v1669_v21 = vsel %vm1104_vm7, %v1668_v5, %v1667_v11 }
 0x19f   : > { %v1109_v22 = vrot.slane %v1076_v17, 1  ;;  %v1293_v23 = vrot.slane %v1076_v17, 2  ;;  %v1483_v24 = vrot.slane %v1076_v17, 3  ;;  %v1672_v25 = vrot.slane %v1076_v17, 4  ;;  %v2224_v26 = vpop.f32.mrb[7].mxu1 }
 0x1a0   : > { %v1108_v27 = vsel %vm1107_vm8, %v1106_v12, %v1105_v18  ;;  %v1292_v28 = vsel %vm1107_vm8, %v1291_v13, %v1290_v19  ;;  %v1482_v29 = vsel %vm1107_vm8, %v1481_v14, %v1480_v20  ;;  %v1671_v30 = vsel %vm1107_vm8, %v1670_v15, %v1669_v21 }
 0x1a1   : > { %v1111_v31 = vsel %vm1110_vm9, %v1109_v22, %v1108_v27  ;;  %v1186_v32 = vpop.f32.mrb[8].mxu0  ;;  %v1294_v33 = vsel %vm1110_vm9, %v1293_v23, %v1292_v28  ;;  %v1484_v34 = vsel %vm1110_vm9, %v1483_v24, %v1482_v29  ;;  %v1673_v35 = vsel %vm1110_vm9, %v1672_v25, %v1671_v30 }
 0x1a2   : > { %v1187_v37 = vadd.f32 %v1186_v32, %v1111_v31  ;;  %v2229_v38 = vpop.f32.mrb[9].mxu0 }
 0x1a4   : > { %v1190_v39 = vmul.f32 0.35355338, %v1187_v37 }
 0x1a6   : > { %v1191_v40 = vsel %vm1113_vm2, %v1190_v39, -inf }
 0x1a7   : > { %1192 = vmax.xlane.f32.xlu0 %v1191_v40 }
 0x203   : > { %v1366_v41 = vpop.f32.mrb[10].mxu0 }
 0x204   : > { %v1367_v42 = vadd.f32 %v1366_v41, %v1294_v33  ;;  %v2239_v43 = vpop.f32.mrb[11].mxu0 }
 0x206   : > { %v1370_v44 = vmul.f32 0.35355338, %v1367_v42 }
 0x207   : > { %v1556_v45 = vpop.f32.mrb[12].mxu0 }
 0x208   : > { %v1557_v46 = vadd.f32 %v1556_v45, %v1484_v34  ;;  %v2249_v47 = vpop.f32.mrb[13].mxu0  ;;  %v1371_v48 = vsel %vm1113_vm2, %v1370_v44, -inf }
 0x209   : > { %1372 = vmax.xlane.f32.xlu1 %v1371_v48 }
 0x20a   : > { %v1560_v49 = vmul.f32 0.35355338, %v1557_v46 }
 0x20c   : > { %v1745_v50 = vpop.f32.mrb[14].mxu0  ;;  %v1561_v51 = vsel %vm1113_vm2, %v1560_v49, -inf }
 0x20d   : > { %v1746_v52 = vadd.f32 %v1745_v50, %v1673_v35  ;;  %v2259_v53 = vpop.f32.mrb[15].mxu0  ;;  %1562 = vmax.xlane.f32.xlu0 %v1561_v51 }
 0x20f   : > { %v1749_v54 = vmul.f32 0.35355338, %v1746_v52 }
 0x211   : > { %v1750_v55 = vsel %vm1113_vm2, %v1749_v54, -inf }
 0x212   : > { %1751 = vmax.xlane.f32.xlu0 %v1750_v55 }
 0x21a   : > { %1385 = vrot.lane.b32.xlu1 %v3083_v36, %s2666_s20 }
 0x234   : > { %v1193_v56 = vpop.xlane.xlu0 %1192 }
 0x235   : > { %v1194_v57 = vsub.f32 %v1190_v39, %v1193_v56 }
 0x237   : > { %v1195_v58 = vmul.f32 1.442695, %v1194_v57 }
 0x239   : > { %2365 = vpow2.f32 %v1195_v58 }
 0x243   : > { %v2366_v59 = vpop.eup %2365 }
 0x244   : > { %v1197_v60 = vsel %vm1113_vm2, %v2366_v59, 0.0 }
 0x245   : > { %1198 = vadd.xlane.f32.xlu1 %v1197_v60 }
 0x296   : > { %v1373_v61 = vpop.xlane.xlu1 %1372 }
 0x297   : > { %v1374_v62 = vsub.f32 %v1370_v44, %v1373_v61 }
 0x299   : > { %v1375_v63 = vmul.f32 1.442695, %v1374_v62 }
 0x29a   : > { %v1563_v1 = vpop.xlane.xlu0 %1562  ;;  %v1386_v13 = vpop.permute.xlu1 %1385 }
 0x29b   : > { %2367 = vpow2.f32 %v1375_v63  ;;  %v1564_v2 = vsub.f32 %v1560_v49, %v1563_v1 }
 0x29d   : > { %v1565_v3 = vmul.f32 1.442695, %v1564_v2 }
 0x29f   : > { %2369 = vpow2.f32 %v1565_v3  ;;  %v1752_v4 = vpop.xlane.xlu0 %1751 }
 0x2a0   : > { %v1753_v5 = vsub.f32 %v1749_v54, %v1752_v4 }
 0x2a2   : > { %v1754_v6 = vmul.f32 1.442695, %v1753_v5 }
 0x2a4   : > { %2371 = vpow2.f32 %v1754_v6 }
 0x2a5   : > { %v2368_v7 = vpop.eup %2367 }
 0x2a6   : > { %v1377_v8 = vsel %vm1113_vm2, %v2368_v7, 0.0 }
 0x2a7   : > { %1378 = vadd.xlane.f32.xlu0 %v1377_v8 }
 0x2a9   : > { %v2370_v9 = vpop.eup %2369 }
 0x2aa   : > { %v1567_v10 = vsel %vm1113_vm2, %v2370_v9, 0.0 }
 0x2ab   : > { %1568 = vadd.xlane.f32.xlu1 %v1567_v10 }
 0x2ae   : > { %v2372_v11 = vpop.eup %2371 }
 0x2af   : > { %v1756_v12 = vsel %vm1113_vm2, %v2372_v11, 0.0 }
 0x2b0   : > { %1757 = vadd.xlane.f32.xlu0 %v1756_v12 }
 0x2bc   : > { %1763 = vrot.lane.b32.xlu1 %v3083_v36, %s2668_s3 }
 0x2c6   : > { %1574 = vrot.lane.b32.xlu0 %v3083_v36, %s2667_s14 }
 0x2d2   : > { %v1199_v14 = vpop.xlane.xlu1 %1198 }
 0x2d3   : > { %2373 = vrcp.f32 %v1199_v14 }
 0x2dd   : > { %v2374_v15 = vpop.eup %2373 }
 0x2de   : > { %v1201_v16 = vmul.f32 %v2374_v15, %v2366_v59 }
 0x2e0   : > { %1202 = vst.msk [vmem:[%s3123_s13] sm:$0xff] %vm1113_vm2, %v1201_v16  ;;  %2233 = vmatmul.mubr.msk.f32.vlgmr.msra.gmra.mrb[8].mxu1 %vm1113_vm2, %v1201_v16 }
 0x2e1   : > { %2241 = vmatpush3.msra.mxu1 %v1386_v13  ;;  %2242 = vmatprep.mubr.msk.f32.mxu1 %vm2665_vm0, %v2664_v0 }
 0x2e2   : > { %2250 = vmatprep.subr.mxu1 %v2664_v0 }
 0x334   : > { %v1379_v36 = vpop.xlane.xlu0 %1378 }
 0x335   : > { %2375 = vrcp.f32 %v1379_v36 }
 0x338   : > { %v1569_v17 = vpop.xlane.xlu1 %1568 }
 0x339   : > { %2377 = vrcp.f32 %v1569_v17 }
 0x33c   : > { %v1764_v24 = vpop.permute.xlu1 %1763 }
 0x33d   : > { %v1758_v18 = vpop.xlane.xlu0 %1757 }
 0x33e   : > { %2379 = vrcp.f32 %v1758_v18 }
 0x33f   : > { %v2376_v19 = vpop.eup %2375 }
 0x340   : > { %v1381_v20 = vmul.f32 %v2376_v19, %v2368_v7 }
 0x341   : > { %v1575_v21 = vpop.permute.xlu0 %1574 }
 0x342   : > { %2133 = vst.msk [vmem:[%s3123_s13 + $0x8] sm:$0xff] %vm1113_vm2, %v1381_v20  ;;  %2243 = vmatmul.mubr.msk.f32.vlgmr.msra.gmra.mrb[10].mxu1 %vm1113_vm2, %v1381_v20 }
 0x343   : > { %v2378_v22 = vpop.eup %2377  ;;  %2251 = vmatpush3.msra.mxu1 %v1575_v21  ;;  %2252 = vmatprep.mubr.msk.f32.mxu1 %vm2665_vm0, %v2664_v0 }
 0x344   : > { %v1571_v23 = vmul.f32 %v2378_v22, %v2370_v9  ;;  %2260 = vmatprep.subr.mxu1 %v2664_v0 }
 0x346   : > { %2137 = vst.msk [vmem:[%s3123_s13 + $0x10] sm:$0xff] %vm1113_vm2, %v1571_v23  ;;  %2253 = vmatmul.mubr.msk.f32.vlgmr.msra.gmra.mrb[12].mxu1 %vm1113_vm2, %v1571_v23 }
 0x347   : > { %2261 = vmatpush3.msra.mxu1 %v1764_v24  ;;  %2262 = vmatprep.mubr.msk.f32.mxu1 %vm2665_vm0, %v2664_v0 }
 0x348   : > { %v2380_v25 = vpop.eup %2379 }
 0x349   : > { %v1760_v26 = vmul.f32 %v2380_v25, %v2372_v11 }
 0x34b   : > { %2141 = vst.msk [vmem:[%s3123_s13 + $0x18] sm:$0xff] %vm1113_vm2, %v1760_v26  ;;  %2263 = vmatmul.mubr.msk.f32.vlgmr.msra.gmra.mrb[14].mxu1 %vm1113_vm2, %v1760_v26 }
 0x3b3   : > { %v1272_v27 = vpop.f32.mrb[8].mxu1 }
 0x3b4   : > { %1276 = vst.msk [vmem:[%s3146_s28] sm:$0xff] %vm1113_vm2, %v1272_v27  ;;  %v2234_v28 = vpop.f32.mrb[9].mxu1 }
 0x415   : > { %v1457_v29 = vpop.f32.mrb[10].mxu1 }
 0x416   : > { %1462 = vrot.lane.b32.xlu1 %v1457_v29, %s2669_s12  ;;  %v2244_v0 = vpop.f32.mrb[11].mxu1 }
 0x417   : > { %2544 = shalt.err (!%p2541_p1)
}
 0x418   : > { %s2545_s23 = scalar_lea.hbm %s3156_s15, 512  ;;  %s2549_s27 = scalar_lea.hbm %s3248_s6, 1024 }
 0x419   : > { %p2546_p6 = scmp.ne.s32.totalorder %s3156_s15, %s2545_s23  ;;  %p2550_p10 = scmp.lt.u32.totalorder %s3156_s15, %s3248_s6 }
 0x41a   : > { %p2551_p3 = scmp.lt.u32.totalorder %s2549_s27, %s2545_s23  ;;  %p2553_p12 = scmp.lt.u32.totalorder %s2545_s23, %s3156_s15 }
 0x41b   : > { %p2547_p7 = pnand %p2546_p6, %p3282_p13 }
 0x41c   : > { %p2552_p8 = por %p2551_p3, %p2550_p10 }
 0x41d   : > { %p2548_p9 = pneg %p2547_p7 }
 0x41e   : > { %p2554_p5 = por %p2553_p12, %p2552_p8 }
 0x420   : > { %p2555_p11 = pnand %p2554_p5, %p2548_p9 }
 0x422   : > { %2558 = shalt.err (!%p2555_p11)
}
 0x423   : > { %s2671_s14 = smov 128   ;;  %v1646_v30 = vpop.f32.mrb[12].mxu1  ;;  %s2672_s3 = smov 16   ;;  %vm1465_vm10 = vcmask 130112   ;;  %vm1654_vm11 = vcmask 195712   ;;  %vm1843_vm12 = vcmask 261312  }
 0x424   : > { %2276 = dma.vmem_to_hbm [thread:$0]  (%p3282_p13), %s3158_s1, 512, %s3156_s15, %s1851_s11, %s2671_s14, %s2671_s14, %s2669_s12   ;;  %v2254_v31 = vpop.f32.mrb[13].mxu1 }
 0x425   : > { %1651 = vrot.lane.b32.xlu0 %v1646_v30, %s2672_s3  ;;  %v1835_v32 = vpop.f32.mrb[14].mxu1  ;;  %s2673_s13 = smov 24   ;;  %s2145_s5 = sshll.u32 %s2645_s24, 7 }
 0x426   : > { %1840 = vrot.lane.b32.xlu1 %v1835_v32, %s2673_s13  ;;  %v2264_v33 = vpop.f32.mrb[15].mxu1  ;;  %s1865_s1 = sshll.u32 %s3146_s28, 4  ;;  %s3283_s21 = sld [smem:[#allocation26_spill]]  ;;  %s3194_s1 = int_to_ptr.vmem [resolvable:$true] %s1865_s1 }
 0x427   : > { %s1846_s16 = scalar_lea.sflag [#allocation4], %s2964_s29  ;;  %s2559_s17 = scalar_lea.vmem %s3194_s1, 128 }
 0x428   : > { %p2560_p4 = scmp.ne.s32.totalorder %s3194_s1, %s2559_s17  ;;  %s2674_s24 = smov [#allocation11]  }
 0x429   : > { %s2563_s30 = sshll.u32 %s2674_s24, 4  ;;  %s2564_s30 = int_to_ptr.vmem [resolvable:$false] %s2563_s30 }
 0x42a   : > { %p2561_p0 = pnand %p2560_p4, %p3282_p13  ;;  %s2565_s18 = scalar_lea.vmem %s2564_s30, 256 }
 0x42b   : > { %p2566_p1 = scmp.lt.s32.totalorder %s3194_s1, %s2564_s30  ;;  %p2567_p6 = scmp.lt.s32.totalorder %s2565_s18, %s2559_s17 }
 0x42c   : > { %s3284_s15 = smov %s3283_s21  ;;  %s3192_s11 = scalar_lea.hbm %s3283_s21, %s2145_s5 }
 0x42d   : > { %p2562_p2 = pneg %p2561_p0  ;;  %p2568_p7 = por %p2567_p6, %p2566_p1 }
 0x42f   : > { %p2569_p9 = pnand %p2568_p7, %p2562_p2 }
 0x488   : > { %v1463_v34 = vpop.permute.xlu1 %1462 }
 0x489   : > { %1466 = vst.msk [vmem:[%s3146_s28] sm:$0xff] %vm1465_vm10, %v1463_v34 }
 0x497   : > { %v1652_v35 = vpop.permute.xlu0 %1651 }
 0x498   : > { %1655 = vst.msk [vmem:[%s3146_s28] sm:$0xff] %vm1654_vm11, %v1652_v35  ;;  %v1841_v37 = vpop.permute.xlu1 %1840 }
 0x499   : > { %1844 = vst.msk [vmem:[%s3146_s28] sm:$0xff] %vm1843_vm12, %v1841_v37 }
 0x49a   : > { %2572 = shalt.err (!%p2569_p9)
}
 0x49b   : > { %s2573_s29 = scalar_lea.hbm %s3192_s11, 128  ;;  %s2577_s7 = scalar_lea.hbm %s3284_s15, 256 }
 0x49c   : > { %p2574_p10 = scmp.ne.s32.totalorder %s3192_s11, %s2573_s29  ;;  %p2578_p12 = scmp.lt.u32.totalorder %s3192_s11, %s3284_s15 }
 0x49d   : > { %p2579_p5 = scmp.lt.u32.totalorder %s2577_s7, %s2573_s29  ;;  %p2581_p4 = scmp.lt.u32.totalorder %s2573_s29, %s3192_s11 }
 0x49e   : > { %p2575_p3 = pnand %p2574_p10, %p3282_p13 }
 0x49f   : > { %p2580_p11 = por %p2579_p5, %p2578_p12 }
 0x4a0   : > { %p2576_p8 = pneg %p2575_p3 }
 0x4a1   : > { %p2582_p0 = por %p2581_p4, %p2580_p11 }
 0x4a3   : > { %p2583_p2 = pnand %p2582_p0, %p2576_p8 }
 0x4a5   : > { %2586 = shalt.err (!%p2583_p2)
}
 0x4a6   : > { %2275 = dma.vmem_to_hbm [thread:$0]  (%p3282_p13), %s3194_s1, 128, %s3192_s11, %s1846_s16  }
 0x4a7 PF: > { %s3285_s9 = sld [smem:[#allocation19_spill]]  ;;  %s3286_s20 = sld [smem:[#allocation23_spill]] }
 0x4a8   : > { %p3288_p6 = scmp.ge.s32.totalorder %s2653_s26, 2 }
 0x4ad   : > { %s1894_s14 = sand.u32 1, %s3285_s9   ;;  %p3287_p1 = scmp.ne.s32.totalorder %s3286_s20, 0 }
 0x4ae   : > { %s1895_s3 = scalar_lea.sflag [#allocation4], %s1894_s14 }
 0x4af   : > { %p2296_p7 = pnand %p3288_p6, %p3287_p1 }
 0x4b1   : > { %2624 = dma.done.wait (!%p2296_p7), %s1895_s3, 128  }
 0x4b2   : > { %2626 = vsyncadd (!%p2296_p7), %s1895_s3, 4294967168  ;;  %s1904_s13 = scalar_lea.sflag [#allocation13], %s1894_s14 }
 0x4b3   : > { %2628 = dma.done.wait (!%p2296_p7), %s1904_s13, 512  }
 0x4b4   : > { %2630 = vsyncadd (!%p2296_p7), %s1904_s13, 4294966784  ;;  %s32_s26 = sadd.s32 1, %s2653_s26   ;;  %s3289_s10 = sld [smem:[#allocation20_spill]] }
 0x4b5   : > { %p29_p9 = scmp.ge.s32.totalorder %s32_s26, 4   ;;  %s3290_s23 = sld [smem:[#allocation22_spill]] }
 0x4b6   : > { %s3291_s5 = sld [smem:[#allocation21_spill]]  ;;  %s3292_s21 = smov %s2637_s22 }
 0x4b7   : > { %s3294_s24 = smov %s2649_s25  ;;  %31 = sbr.rel (!%p29_p9) target bundleno = 16 (0x10), region = 153 }
 0x4ba   : > { %s3293_s22 = smov %s3289_s10 }
 0x4bc   : > { %s3295_s25 = smov %s3291_s5 }
 0x4be   :  { %1909 = vsyncpa [#allocation3], 1 }
 0x4bf   :  { %1911 = vsyncpa [#allocation3 + $0x1], 1 }
 0x4c0   :  { %1912 = vsyncpa [#allocation6], 1 }
 0x4c1   :  { %1914 = vsyncpa [#allocation6 + $0x1], 1 }
 0x4c2   :  { %1915 = vsyncpa [#allocation9], 1 }
 0x4c3   :  { %1917 = vsyncpa [#allocation9 + $0x1], 1 }
 0x4c4   :  { %1918 = vsyncpa [#allocation4], 1 }
 0x4c5   :  { %1920 = vsyncpa [#allocation4 + $0x1], 1 }
 0x4c6   :  { %1921 = vsyncpa [#allocation13], 1 }
 0x4c7   :  { %1923 = vsyncpa [#allocation13 + $0x1], 1 }

</bundles_post_ra>
